<compile_context>
chip_gen: v7x
topology: tpu7x:2x2x1
jax: 0.10.0
libtpu: 0.0.40
codegen_flags: <defaults>
</compile_context>

<pallas_src>
import functools
import math

import jax
import jax.numpy as jnp
import numpy as np
from jax.experimental import pallas as pl
from jax.experimental.pallas import tpu as pltpu


_VMEM_LIMIT = 32 * 1024 * 1024   # explicit scoped-VMEM budget (safe on v5e/v6e/v7x)


def _mosaic_params(*sem):
    return pltpu.CompilerParams(dimension_semantics=sem,
                                vmem_limit_bytes=_VMEM_LIMIT)


# ----------------------------------------------------------------------------
# Pallas kernels
# ----------------------------------------------------------------------------
def _q_proj_rope_kernel(x_ref, wa_ref, wb_ref, ba_ref, bb_ref, cos_ref, sin_ref,
                        q_ref, *, matmul_dtype):
    """NCL block (Cin, TT) -> RoPE'd, pre-scaled query rows (TT, C).

    The rotate-half matrix is pre-folded into wb/bb host-side, so RoPE is just
    two projection matmuls + element-wise cos/sin here (no extra operands).
    """
    xt = x_ref[...].T                       # NCL -> rows, fused in-kernel (XLU)
    wa = wa_ref[...]
    wb = wb_ref[...]
    if matmul_dtype is not None:            # bf16 MXU operands, fp32 accumulate
        xt = xt.astype(matmul_dtype)
        wa = wa.astype(matmul_dtype)
        wb = wb.astype(matmul_dtype)
    qa = jnp.dot(xt, wa, preferred_element_type=jnp.float32) + ba_ref[...].astype(jnp.float32)
    qb = jnp.dot(xt, wb, preferred_element_type=jnp.float32) + bb_ref[...].astype(jnp.float32)
    # cos/sin already carry the 1/sqrt(dk) softmax scale (query side only).
    q_ref[...] = (qa * cos_ref[...] + qb * sin_ref[...]).astype(q_ref.dtype)


def _kv_proj_rope_kernel(c_ref, wk_ref, wkr_ref, wv_ref, bk_ref, bkr_ref, bv_ref,
                         cos_ref, sin_ref, k_ref, v_ref, *, matmul_dtype):
    """NCL block (Cin, TT) -> RoPE'd keys (TT, C) and values (TT, C)."""
    ct = c_ref[...].T
    wk, wkr, wv = wk_ref[...], wkr_ref[...], wv_ref[...]
    if matmul_dtype is not None:
        ct = ct.astype(matmul_dtype)
        wk, wkr, wv = (w.astype(matmul_dtype) for w in (wk, wkr, wv))
    ka = jnp.dot(ct, wk, preferred_element_type=jnp.float32) + bk_ref[...].astype(jnp.float32)
    kb = jnp.dot(ct, wkr, preferred_element_type=jnp.float32) + bkr_ref[...].astype(jnp.float32)
    vv = jnp.dot(ct, wv, preferred_element_type=jnp.float32) + bv_ref[...].astype(jnp.float32)
    k_ref[...] = (ka * cos_ref[...] + kb * sin_ref[...]).astype(k_ref.dtype)
    v_ref[...] = vv.astype(v_ref.dtype)


def _attn_kernel(q_ref, k_ref, v_ref, o_ref, a_ref, *, n_heads, dk,
                 matmul_dtype, approx_recip):
    """One (batch, q-tile) step: all heads of softmax(QK^T) @ V.

    q_ref : (TQ, C)   pre-scaled, RoPE'd queries   (C = n_heads * dk)
    k_ref : (t_s, C)  RoPE'd keys
    v_ref : (t_s, C)  values
    o_ref : (TQ, C)   attention output (single full-width store per step)
    a_ref : (n_heads, TQ, t_s)  attention map (fp32, PyTorch layout)
    """
    q = q_ref[...]
    k = k_ref[...]
    v = v_ref[...]
    # TODO(synk): a fully head-batched dot_general (H as batch dim) would also
    #             remove these per-head value slices; kept per-head dots with a
    #             single fused full-width output store for lowering safety.
    outs = []
    for h in range(n_heads):
        sl = slice(h * dk, (h + 1) * dk)
        # Contract the last dims of both operands -> no materialized K^T.
        s = jax.lax.dot_general(q[:, sl], k[:, sl], (((1,), (1,)), ((), ())),
                                preferred_element_type=jnp.float32)
        s = s - jnp.max(s, axis=-1, keepdims=True)
        e = jnp.exp(s)
        p = e * pl.reciprocal(jnp.sum(e, axis=-1, keepdims=True), approx=approx_recip)
        a_ref[h] = p.astype(a_ref.dtype)
        pm = p.astype(matmul_dtype) if matmul_dtype is not None else p
        outs.append(jnp.dot(pm, v[:, sl], preferred_element_type=jnp.float32))
    # One lane-dense (TQ, C) store instead of n_heads masked dk-wide stores.
    o_ref[...] = jnp.concatenate(outs, axis=-1).astype(o_ref.dtype)


def _out_proj_kernel(a_ref, w_ref, b_ref, o_ref, *, matmul_dtype):
    """conv_o: attention rows (TT, C) @ (C, Cout) + bias, written NCL (Cout, TT)."""
    a = a_ref[...]
    w = w_ref[...]
    if matmul_dtype is not None:
        a = a.astype(matmul_dtype)
        w = w.astype(matmul_dtype)
    acc = jnp.dot(a, w, preferred_element_type=jnp.float32)         # (TT, Cout)
    acc = acc + b_ref[...].astype(jnp.float32)                      # bias row (1, Cout)
    o_ref[...] = acc.T.astype(o_ref.dtype)                          # NCL written in-kernel


# ----------------------------------------------------------------------------
# Pallas wrappers
# ----------------------------------------------------------------------------
# TODO(synk): on v7x, single-buffer the constant-index operands (weights, bias,
#             rope tables, and k/v across q-tiles) via pipeline_mode=pl.Buffered(1)
#             to reclaim VMEM for bigger compute tiles.

def project_queries(x, wq, wqr, bq, bqr, cos_q, sin_q, *, matmul_dtype, time_tile):
    b, cin, t = x.shape
    cch = wq.shape[1]
    tt = t if t <= time_tile else time_tile
    out_dtype = matmul_dtype if matmul_dtype is not None else jnp.float32
    kern = functools.partial(_q_proj_rope_kernel, matmul_dtype=matmul_dtype)
    return pl.pallas_call(
        kern,
        out_shape=jax.ShapeDtypeStruct((b, t, cch), out_dtype),
        grid=(b, pl.cdiv(t, tt)),
        in_specs=[
            pl.BlockSpec((None, cin, tt), lambda bi, ti: (bi, 0, ti)),
            pl.BlockSpec((cin, cch), lambda bi, ti: (0, 0)),
            pl.BlockSpec((cin, cch), lambda bi, ti: (0, 0)),
            pl.BlockSpec((1, cch), lambda bi, ti: (0, 0)),
            pl.BlockSpec((1, cch), lambda bi, ti: (0, 0)),
            pl.BlockSpec((tt, cch), lambda bi, ti: (ti, 0)),
            pl.BlockSpec((tt, cch), lambda bi, ti: (ti, 0)),
        ],
        out_specs=pl.BlockSpec((None, tt, cch), lambda bi, ti: (bi, ti, 0)),
        compiler_params=_mosaic_params("parallel", "parallel"),
    )(x, wq, wqr, bq, bqr, cos_q, sin_q)


def project_keys_values(c, wk, wkr, wv, bk, bkr, bv, cos_k, sin_k, *,
                        matmul_dtype, time_tile):
    b, cin, t = c.shape
    cch = wk.shape[1]
    tt = t if t <= time_tile else time_tile
    out_dtype = matmul_dtype if matmul_dtype is not None else jnp.float32
    kern = functools.partial(_kv_proj_rope_kernel, matmul_dtype=matmul_dtype)
    return pl.pallas_call(
        kern,
        out_shape=(jax.ShapeDtypeStruct((b, t, cch), out_dtype),
                   jax.ShapeDtypeStruct((b, t, cch), out_dtype)),
        grid=(b, pl.cdiv(t, tt)),
        in_specs=[
            pl.BlockSpec((None, cin, tt), lambda bi, ti: (bi, 0, ti)),
            pl.BlockSpec((cin, cch), lambda bi, ti: (0, 0)),
            pl.BlockSpec((cin, cch), lambda bi, ti: (0, 0)),
            pl.BlockSpec((cin, cch), lambda bi, ti: (0, 0)),
            pl.BlockSpec((1, cch), lambda bi, ti: (0, 0)),
            pl.BlockSpec((1, cch), lambda bi, ti: (0, 0)),
            pl.BlockSpec((1, cch), lambda bi, ti: (0, 0)),
            pl.BlockSpec((tt, cch), lambda bi, ti: (ti, 0)),
            pl.BlockSpec((tt, cch), lambda bi, ti: (ti, 0)),
        ],
        out_specs=(pl.BlockSpec((None, tt, cch), lambda bi, ti: (bi, ti, 0)),
                   pl.BlockSpec((None, tt, cch), lambda bi, ti: (bi, ti, 0))),
        compiler_params=_mosaic_params("parallel", "parallel"),
    )(c, wk, wkr, wv, bk, bkr, bv, cos_k, sin_k)


def batched_cross_attention(q, k, v, n_heads, *, matmul_dtype, q_tile):
    """q: (b, t_t, C), k/v: (b, t_s, C) -> out (b, t_t, C), attn (b, H, t_t, t_s)."""
    b, t_t, cch = q.shape
    t_s = k.shape[1]
    dk = cch // n_heads
    tq = t_t if t_t <= q_tile else q_tile
    out_dtype = matmul_dtype if matmul_dtype is not None else jnp.float32
    kern = functools.partial(_attn_kernel, n_heads=n_heads, dk=dk,
                             matmul_dtype=matmul_dtype,
                             approx_recip=matmul_dtype is not None)
    # TODO(synk): for very long t_s, additionally tile t_s with an online
    #             (flash-style) softmax; for tiny shapes, process several batch
    #             elements per grid step to amortize step overhead.
    # TODO(synk): the attn map could be emitted bf16 (or skipped) when the
    #             caller doesn't need fp32 probabilities.
    out, attn = pl.pallas_call(
        kern,
        out_shape=(jax.ShapeDtypeStruct((b, t_t, cch), out_dtype),
                   jax.ShapeDtypeStruct((b, n_heads, t_t, t_s), jnp.float32)),
        grid=(b, pl.cdiv(t_t, tq)),
        in_specs=[
            pl.BlockSpec((None, tq, cch), lambda bi, qi: (bi, qi, 0)),
            pl.BlockSpec((None, t_s, cch), lambda bi, qi: (bi, 0, 0)),
            pl.BlockSpec((None, t_s, cch), lambda bi, qi: (bi, 0, 0)),
        ],
        out_specs=(
            pl.BlockSpec((None, tq, cch), lambda bi, qi: (bi, qi, 0)),
            pl.BlockSpec((None, n_heads, tq, t_s), lambda bi, qi: (bi, 0, qi, 0)),
        ),
        compiler_params=_mosaic_params("parallel", "parallel"),
    )(q, k, v)
    return out, attn


def output_projection_ncl(o_rows, w_o, b_o, out_dtype, *, matmul_dtype, time_tile):
    """o_rows: (b, t, C) -> NCL output (b, Cout, t); transpose done in-kernel."""
    b, t, cch = o_rows.shape
    cout = w_o.shape[1]
    tt = t if t <= time_tile else time_tile
    kern = functools.partial(_out_proj_kernel, matmul_dtype=matmul_dtype)
    return pl.pallas_call(
        kern,
        out_shape=jax.ShapeDtypeStruct((b, cout, t), out_dtype),
        grid=(b, pl.cdiv(t, tt)),
        in_specs=[
            pl.BlockSpec((None, tt, cch), lambda bi, ti: (bi, ti, 0)),
            pl.BlockSpec((cch, cout), lambda bi, ti: (0, 0)),
            pl.BlockSpec((1, cout), lambda bi, ti: (0, 0)),
        ],
        out_specs=pl.BlockSpec((None, cout, tt), lambda bi, ti: (bi, 0, ti)),
        compiler_params=_mosaic_params("parallel", "parallel"),
    )(o_rows, w_o, b_o)


# ----------------------------------------------------------------------------
# RoPE constants (host-side)
# ----------------------------------------------------------------------------
def _rope_tables(t, n_heads, dk, d_rope, scale=1.0, base=10000.0):
    """cos/sin tables on the flat head-major channel axis: each (t, n_heads*dk)."""
    theta = 1.0 / (base ** (jnp.arange(0, d_rope, 2, dtype=jnp.float32) / d_rope))
    idx = jnp.arange(t, dtype=jnp.float32)[:, None] * theta[None, :]
    idx2 = jnp.concatenate([idx, idx], axis=1)                      # (t, d_rope)
    cos_h = jnp.concatenate([jnp.cos(idx2),
                             jnp.ones((t, dk - d_rope), jnp.float32)], axis=1)
    sin_h = jnp.concatenate([jnp.sin(idx2),
                             jnp.zeros((t, dk - d_rope), jnp.float32)], axis=1)
    return scale * jnp.tile(cos_h, (1, n_heads)), scale * jnp.tile(sin_h, (1, n_heads))


def _rope_rot_matrix(n_heads, dk, d_rope):
    """Block-diagonal 0/+-1 matrix R so (x @ R) == rotate-half(x) per head."""
    d2 = d_rope // 2
    Rh = np.zeros((dk, dk), np.float32)
    for j in range(d2):
        Rh[j + d2, j] = -1.0          # out[j] gets -x[j+d2]
    for j in range(d2, d_rope):
        Rh[j - d2, j] = 1.0           # out[j] gets +x[j-d2]
    return jnp.asarray(np.kron(np.eye(n_heads, dtype=np.float32), Rh))


# ----------------------------------------------------------------------------
# Forward pass
# ----------------------------------------------------------------------------
def multi_head_attention_cross(x, c, params, n_heads, *, matmul_dtype=jnp.bfloat16,
                               q_tile=256, time_tile=512):
    """x: (b, channels, t_t) NCL, c: (b, channels, t_s) NCL."""
    b, channels, t_t = x.shape
    t_s = c.shape[2]
    assert channels % n_heads == 0
    dk = channels // n_heads
    d_rope = int(dk * 0.5)
    assert d_rope >= 2 and d_rope % 2 == 0, (
        "RoPE dim (k_channels*0.5) must be an even number >= 2; otherwise the "
        "rotary branch would silently degenerate.")
    scale = 1.0 / math.sqrt(dk)

    # Fold the rotate-half signed permutation into the weights (exact in fp32).
    rot = _rope_rot_matrix(n_heads, dk, d_rope)
    w_qr, b_qr = params["w_q"] @ rot, params["b_q"] @ rot
    w_kr, b_kr = params["w_k"] @ rot, params["b_k"] @ rot

    # cos/sin tables on the flat channel axis; 1/sqrt(dk) folded into the
    # query tables (cheaper than scaling the (t_t, t_s) scores per head).
    cos_q, sin_q = _rope_tables(t_t, n_heads, dk, d_rope, scale=scale)
    cos_k, sin_k = _rope_tables(t_s, n_heads, dk, d_rope)

    q = project_queries(x, params["w_q"], w_qr, params["b_q"], b_qr, cos_q, sin_q,
                        matmul_dtype=matmul_dtype, time_tile=time_tile)
    k, v = project_keys_values(c, params["w_k"], w_kr, params["w_v"],
                               params["b_k"], b_kr, params["b_v"], cos_k, sin_k,
                               matmul_dtype=matmul_dtype, time_tile=time_tile)
    o_rows, attn_map = batched_cross_attention(q, k, v, n_heads,
                                               matmul_dtype=matmul_dtype,
                                               q_tile=q_tile)
    out = output_projection_ncl(o_rows, params["w_o"], params["b_o"], x.dtype,
                                matmul_dtype=matmul_dtype, time_tile=time_tile)
    return out, attn_map


# ----------------------------------------------------------------------------
# Parameter init (mirrors shapes of the PyTorch module)
# ----------------------------------------------------------------------------
def init_params(key, channels, out_channels):
    def xavier(key, fan_in, fan_out):
        bound = math.sqrt(6.0 / (fan_in + fan_out))
        return jax.random.uniform(key, (fan_in, fan_out), jnp.float32, -bound, bound)

    ks = jax.random.split(key, 8)
    return {
        "w_q": xavier(ks[0], channels, channels),
        "b_q": 0.05 * jax.random.normal(ks[1], (1, channels), jnp.float32),
        "w_k": xavier(ks[2], channels, channels),
        "b_k": 0.05 * jax.random.normal(ks[3], (1, channels), jnp.float32),
        "w_v": xavier(ks[4], channels, channels),
        "b_v": 0.05 * jax.random.normal(ks[5], (1, channels), jnp.float32),
        "w_o": xavier(ks[6], channels, out_channels),
        "b_o": 0.05 * jax.random.normal(ks[7], (1, out_channels), jnp.float32),
    }


# ----------------------------------------------------------------------------
# Pure-JAX reference (sanity check only)
# ----------------------------------------------------------------------------
def _apply_rope_ref(xh, d_rope, base=10000.0):
    """xh: (b, h, t, dk); rotate-half RoPE on the first d_rope features."""
    t = xh.shape[2]
    theta = 1.0 / (base ** (jnp.arange(0, d_rope, 2, dtype=jnp.float32) / d_rope))
    idx = jnp.einsum("n,d->nd", jnp.arange(t, dtype=jnp.float32), theta)
    idx2 = jnp.concatenate([idx, idx], axis=1)
    cos = jnp.cos(idx2)[None, None]
    sin = jnp.sin(idx2)[None, None]
    x_rope, x_pass = xh[..., :d_rope], xh[..., d_rope:]
    d2 = d_rope // 2
    neg_half = jnp.concatenate([-x_rope[..., d2:], x_rope[..., :d2]], axis=-1)
    x_rope = x_rope * cos + neg_half * sin
    return jnp.concatenate([x_rope, x_pass], axis=-1)


def reference_forward(x, c, params, n_heads):
    b, channels, t_t = x.shape
    t_s = c.shape[2]
    dk = channels // n_heads

    def conv1x1(inp, w, bias):  # inp (b, Cin, t)
        return jnp.einsum("bit,io->bot", inp, w) + bias.reshape(1, -1, 1)

    q = conv1x1(x, params["w_q"], params["b_q"])
    k = conv1x1(c, params["w_k"], params["b_k"])
    v = conv1x1(c, params["w_v"], params["b_v"])
    qh = q.reshape(b, n_heads, dk, t_t).transpose(0, 1, 3, 2)
    kh = k.reshape(b, n_heads, dk, t_s).transpose(0, 1, 3, 2)
    vh = v.reshape(b, n_heads, dk, t_s).transpose(0, 1, 3, 2)
    d_rope = int(dk * 0.5)
    qh = _apply_rope_ref(qh, d_rope)
    kh = _apply_rope_ref(kh, d_rope)
    s = jnp.einsum("bhqd,bhkd->bhqk", qh, kh) / math.sqrt(dk)
    p = jax.nn.softmax(s, axis=-1)
    o = jnp.einsum("bhqk,bhkd->bhqd", p, vh)
    o = o.transpose(0, 1, 3, 2).reshape(b, channels, t_t)
    o = conv1x1(o, params["w_o"], params["b_o"])
    return o, p


# ----------------------------------------------------------------------------
if __name__ == "__main__":
    key = jax.random.PRNGKey(0)
    k_param, k_x, k_c = jax.random.split(key, 3)

    batch = 2
    channels = 32
    out_channels = 32
    n_heads = 4       # -> k_channels = 8, rope dim 4
    t_t = 16          # query (synthesis) length
    t_s = 8           # key/value (reference) length

    params = init_params(k_param, channels, out_channels)
    x = jax.random.normal(k_x, (batch, channels, t_t), jnp.float32)
    c = jax.random.normal(k_c, (batch, channels, t_s), jnp.float32)

    ref_out, ref_attn = reference_forward(x, c, params, n_heads)

    # Default (production) path: bf16 MXU operands + bf16 inter-kernel tensors.
    fwd_bf16 = jax.jit(functools.partial(multi_head_attention_cross, n_heads=n_heads))
    out_bf16, attn_bf16 = jax.block_until_ready(fwd_bf16(x, c, params))
    assert out_bf16.shape == (batch, out_channels, t_t)
    assert attn_bf16.shape == (batch, n_heads, t_t, t_s)
    # bf16 MXU operands drift from the fp32 reference; loose bound by design.
    assert float(jnp.max(jnp.abs(out_bf16 - ref_out))) < 0.25
    assert float(jnp.max(jnp.abs(attn_bf16 - ref_attn))) < 0.1

    # Strict fp32 parity path (matmul_dtype=None, exact reciprocal).
    fwd_f32 = jax.jit(functools.partial(multi_head_attention_cross, n_heads=n_heads,
                                        matmul_dtype=None))
    out_f32, attn_f32 = jax.block_until_ready(fwd_f32(x, c, params))
    assert jnp.allclose(out_f32, ref_out, atol=1e-4, rtol=1e-4)
    assert jnp.allclose(attn_f32, ref_attn, atol=1e-4, rtol=1e-4)

    print("KERNEL_OK")
</pallas_src>

<mosaic_0001>
module attributes {stable_mosaic.version = 11 : i64} {
  func.func @_attn_kernel(%arg0: i32, %arg1: i32, %arg2: memref<1x16x32xbf16, #tpu.memory_space<vmem>>, %arg3: memref<1x8x32xbf16, #tpu.memory_space<vmem>>, %arg4: memref<1x8x32xbf16, #tpu.memory_space<vmem>>, %arg5: memref<1x16x32xbf16, #tpu.memory_space<vmem>>, %arg6: memref<1x4x16x8xf32, #tpu.memory_space<vmem>>) attributes {dimension_semantics = [#tpu.dimension_semantics<parallel>, #tpu.dimension_semantics<parallel>], iteration_bounds = array<i64: 2, 1>, scalar_prefetch = 0 : i64, scratch_operands = 0 : i64, tpu.core_type = #tpu.core_type<tc>, window_params = [{transform_indices = @transform_0, window_bounds = array<i64: 1, 16, 32>}, {transform_indices = @transform_1, window_bounds = array<i64: 1, 8, 32>}, {transform_indices = @transform_2, window_bounds = array<i64: 1, 8, 32>}, {transform_indices = @transform_3, window_bounds = array<i64: 1, 16, 32>}, {transform_indices = @transform_4, window_bounds = array<i64: 1, 4, 16, 8>}]} {
    %c0 = arith.constant 0 : index
    %c0_0 = arith.constant 0 : index
    %c0_1 = arith.constant 0 : index
    %0 = vector.load %arg2[%c0, %c0_0, %c0_1] : memref<1x16x32xbf16, #tpu.memory_space<vmem>>, vector<1x16x32xbf16>
    %1 = vector.shape_cast %0 : vector<1x16x32xbf16> to vector<16x32xbf16>
    %c0_2 = arith.constant 0 : index
    %c0_3 = arith.constant 0 : index
    %c0_4 = arith.constant 0 : index
    %2 = vector.load %arg3[%c0_2, %c0_3, %c0_4] : memref<1x8x32xbf16, #tpu.memory_space<vmem>>, vector<1x8x32xbf16>
    %3 = vector.shape_cast %2 : vector<1x8x32xbf16> to vector<8x32xbf16>
    %c0_5 = arith.constant 0 : index
    %c0_6 = arith.constant 0 : index
    %c0_7 = arith.constant 0 : index
    %4 = vector.load %arg4[%c0_5, %c0_6, %c0_7] : memref<1x8x32xbf16, #tpu.memory_space<vmem>>, vector<1x8x32xbf16>
    %5 = vector.shape_cast %4 : vector<1x8x32xbf16> to vector<8x32xbf16>
    %6 = vector.extract_strided_slice %1 {offsets = [0, 0], sizes = [16, 8], strides = [1, 1]} : vector<16x32xbf16> to vector<16x8xbf16>
    %7 = vector.extract_strided_slice %3 {offsets = [0, 0], sizes = [8, 8], strides = [1, 1]} : vector<8x32xbf16> to vector<8x8xbf16>
    %cst = arith.constant dense<0.000000e+00> : vector<16x8xf32>
    %8 = tpu.matmul %6, %7, %cst {dimension_numbers = #tpu.dot_dimension_numbers<[1], [1], [0], [0], [0, 0, 1, 0], [], []>} : vector<16x8xbf16>, vector<8x8xbf16>, vector<16x8xf32> -> vector<16x8xf32>
    %cst_8 = arith.constant dense<0xFF800000> : vector<16xf32>
    %9 = vector.multi_reduction <maximumf>, %8, %cst_8 [1] : vector<16x8xf32> to vector<16xf32>
    %10 = vector.shape_cast %9 : vector<16xf32> to vector<16x1xf32>
    %11 = vector.broadcast %10 : vector<16x1xf32> to vector<16x8xf32>
    %12 = arith.subf %8, %11 : vector<16x8xf32>
    %13 = math.exp %12 : vector<16x8xf32>
    %cst_9 = arith.constant dense<0.000000e+00> : vector<16xf32>
    %14 = vector.multi_reduction <add>, %13, %cst_9 [1] : vector<16x8xf32> to vector<16xf32>
    %15 = vector.shape_cast %14 : vector<16xf32> to vector<16x1xf32>
    %16 = tpu.reciprocal %15 {approx = true} : vector<16x1xf32> -> vector<16x1xf32>
    %17 = vector.broadcast %16 : vector<16x1xf32> to vector<16x8xf32>
    %18 = arith.mulf %13, %17 : vector<16x8xf32>
    %c0_10 = arith.constant 0 : index
    %c0_11 = arith.constant 0 : index
    %c0_12 = arith.constant 0 : index
    %c0_13 = arith.constant 0 : index
    %19 = vector.load %arg6[%c0_10, %c0_11, %c0_12, %c0_13] : memref<1x4x16x8xf32, #tpu.memory_space<vmem>>, vector<1x1x16x8xf32>
    %20 = vector.shape_cast %19 : vector<1x1x16x8xf32> to vector<16x8xf32>
    %21 = vector.shape_cast %18 : vector<16x8xf32> to vector<1x1x16x8xf32>
    tpu.vector_store %arg6[%c0_10, %c0_11, %c0_12, %c0_13], %21 {strides = array<i32>} : memref<1x4x16x8xf32, #tpu.memory_space<vmem>>, vector<1x1x16x8xf32>,
    %22 = arith.truncf %18 : vector<16x8xf32> to vector<16x8xbf16>
    %23 = vector.extract_strided_slice %5 {offsets = [0, 0], sizes = [8, 8], strides = [1, 1]} : vector<8x32xbf16> to vector<8x8xbf16>
    %cst_14 = arith.constant dense<0.000000e+00> : vector<16x8xf32>
    %24 = tpu.matmul %22, %23, %cst_14 {dimension_numbers = #tpu.dot_dimension_numbers<[1], [0], [0], [1], [0, 0, 1, 1], [], []>} : vector<16x8xbf16>, vector<8x8xbf16>, vector<16x8xf32> -> vector<16x8xf32>
    %25 = vector.extract_strided_slice %1 {offsets = [0, 8], sizes = [16, 8], strides = [1, 1]} : vector<16x32xbf16> to vector<16x8xbf16>
    %26 = vector.extract_strided_slice %3 {offsets = [0, 8], sizes = [8, 8], strides = [1, 1]} : vector<8x32xbf16> to vector<8x8xbf16>
    %cst_15 = arith.constant dense<0.000000e+00> : vector<16x8xf32>
    %27 = tpu.matmul %25, %26, %cst_15 {dimension_numbers = #tpu.dot_dimension_numbers<[1], [1], [0], [0], [0, 0, 1, 0], [], []>} : vector<16x8xbf16>, vector<8x8xbf16>, vector<16x8xf32> -> vector<16x8xf32>
    %cst_16 = arith.constant dense<0xFF800000> : vector<16xf32>
    %28 = vector.multi_reduction <maximumf>, %27, %cst_16 [1] : vector<16x8xf32> to vector<16xf32>
    %29 = vector.shape_cast %28 : vector<16xf32> to vector<16x1xf32>
    %30 = vector.broadcast %29 : vector<16x1xf32> to vector<16x8xf32>
    %31 = arith.subf %27, %30 : vector<16x8xf32>
    %32 = math.exp %31 : vector<16x8xf32>
    %cst_17 = arith.constant dense<0.000000e+00> : vector<16xf32>
    %33 = vector.multi_reduction <add>, %32, %cst_17 [1] : vector<16x8xf32> to vector<16xf32>
    %34 = vector.shape_cast %33 : vector<16xf32> to vector<16x1xf32>
    %35 = tpu.reciprocal %34 {approx = true} : vector<16x1xf32> -> vector<16x1xf32>
    %36 = vector.broadcast %35 : vector<16x1xf32> to vector<16x8xf32>
    %37 = arith.mulf %32, %36 : vector<16x8xf32>
    %c0_18 = arith.constant 0 : index
    %c1 = arith.constant 1 : index
    %c0_19 = arith.constant 0 : index
    %c0_20 = arith.constant 0 : index
    %38 = vector.load %arg6[%c0_18, %c1, %c0_19, %c0_20] : memref<1x4x16x8xf32, #tpu.memory_space<vmem>>, vector<1x1x16x8xf32>
    %39 = vector.shape_cast %38 : vector<1x1x16x8xf32> to vector<16x8xf32>
    %40 = vector.shape_cast %37 : vector<16x8xf32> to vector<1x1x16x8xf32>
    tpu.vector_store %arg6[%c0_18, %c1, %c0_19, %c0_20], %40 {strides = array<i32>} : memref<1x4x16x8xf32, #tpu.memory_space<vmem>>, vector<1x1x16x8xf32>,
    %41 = arith.truncf %37 : vector<16x8xf32> to vector<16x8xbf16>
    %42 = vector.extract_strided_slice %5 {offsets = [0, 8], sizes = [8, 8], strides = [1, 1]} : vector<8x32xbf16> to vector<8x8xbf16>
    %cst_21 = arith.constant dense<0.000000e+00> : vector<16x8xf32>
    %43 = tpu.matmul %41, %42, %cst_21 {dimension_numbers = #tpu.dot_dimension_numbers<[1], [0], [0], [1], [0, 0, 1, 1], [], []>} : vector<16x8xbf16>, vector<8x8xbf16>, vector<16x8xf32> -> vector<16x8xf32>
    %44 = vector.extract_strided_slice %1 {offsets = [0, 16], sizes = [16, 8], strides = [1, 1]} : vector<16x32xbf16> to vector<16x8xbf16>
    %45 = vector.extract_strided_slice %3 {offsets = [0, 16], sizes = [8, 8], strides = [1, 1]} : vector<8x32xbf16> to vector<8x8xbf16>
    %cst_22 = arith.constant dense<0.000000e+00> : vector<16x8xf32>
    %46 = tpu.matmul %44, %45, %cst_22 {dimension_numbers = #tpu.dot_dimension_numbers<[1], [1], [0], [0], [0, 0, 1, 0], [], []>} : vector<16x8xbf16>, vector<8x8xbf16>, vector<16x8xf32> -> vector<16x8xf32>
    %cst_23 = arith.constant dense<0xFF800000> : vector<16xf32>
    %47 = vector.multi_reduction <maximumf>, %46, %cst_23 [1] : vector<16x8xf32> to vector<16xf32>
    %48 = vector.shape_cast %47 : vector<16xf32> to vector<16x1xf32>
    %49 = vector.broadcast %48 : vector<16x1xf32> to vector<16x8xf32>
    %50 = arith.subf %46, %49 : vector<16x8xf32>
    %51 = math.exp %50 : vector<16x8xf32>
    %cst_24 = arith.constant dense<0.000000e+00> : vector<16xf32>
    %52 = vector.multi_reduction <add>, %51, %cst_24 [1] : vector<16x8xf32> to vector<16xf32>
    %53 = vector.shape_cast %52 : vector<16xf32> to vector<16x1xf32>
    %54 = tpu.reciprocal %53 {approx = true} : vector<16x1xf32> -> vector<16x1xf32>
    %55 = vector.broadcast %54 : vector<16x1xf32> to vector<16x8xf32>
    %56 = arith.mulf %51, %55 : vector<16x8xf32>
    %c0_25 = arith.constant 0 : index
    %c2 = arith.constant 2 : index
    %c0_26 = arith.constant 0 : index
    %c0_27 = arith.constant 0 : index
    %57 = vector.load %arg6[%c0_25, %c2, %c0_26, %c0_27] : memref<1x4x16x8xf32, #tpu.memory_space<vmem>>, vector<1x1x16x8xf32>
    %58 = vector.shape_cast %57 : vector<1x1x16x8xf32> to vector<16x8xf32>
    %59 = vector.shape_cast %56 : vector<16x8xf32> to vector<1x1x16x8xf32>
    tpu.vector_store %arg6[%c0_25, %c2, %c0_26, %c0_27], %59 {strides = array<i32>} : memref<1x4x16x8xf32, #tpu.memory_space<vmem>>, vector<1x1x16x8xf32>,
    %60 = arith.truncf %56 : vector<16x8xf32> to vector<16x8xbf16>
    %61 = vector.extract_strided_slice %5 {offsets = [0, 16], sizes = [8, 8], strides = [1, 1]} : vector<8x32xbf16> to vector<8x8xbf16>
    %cst_28 = arith.constant dense<0.000000e+00> : vector<16x8xf32>
    %62 = tpu.matmul %60, %61, %cst_28 {dimension_numbers = #tpu.dot_dimension_numbers<[1], [0], [0], [1], [0, 0, 1, 1], [], []>} : vector<16x8xbf16>, vector<8x8xbf16>, vector<16x8xf32> -> vector<16x8xf32>
    %63 = vector.extract_strided_slice %1 {offsets = [0, 24], sizes = [16, 8], strides = [1, 1]} : vector<16x32xbf16> to vector<16x8xbf16>
    %64 = vector.extract_strided_slice %3 {offsets = [0, 24], sizes = [8, 8], strides = [1, 1]} : vector<8x32xbf16> to vector<8x8xbf16>
    %cst_29 = arith.constant dense<0.000000e+00> : vector<16x8xf32>
    %65 = tpu.matmul %63, %64, %cst_29 {dimension_numbers = #tpu.dot_dimension_numbers<[1], [1], [0], [0], [0, 0, 1, 0], [], []>} : vector<16x8xbf16>, vector<8x8xbf16>, vector<16x8xf32> -> vector<16x8xf32>
    %cst_30 = arith.constant dense<0xFF800000> : vector<16xf32>
    %66 = vector.multi_reduction <maximumf>, %65, %cst_30 [1] : vector<16x8xf32> to vector<16xf32>
    %67 = vector.shape_cast %66 : vector<16xf32> to vector<16x1xf32>
    %68 = vector.broadcast %67 : vector<16x1xf32> to vector<16x8xf32>
    %69 = arith.subf %65, %68 : vector<16x8xf32>
    %70 = math.exp %69 : vector<16x8xf32>
    %cst_31 = arith.constant dense<0.000000e+00> : vector<16xf32>
    %71 = vector.multi_reduction <add>, %70, %cst_31 [1] : vector<16x8xf32> to vector<16xf32>
    %72 = vector.shape_cast %71 : vector<16xf32> to vector<16x1xf32>
    %73 = tpu.reciprocal %72 {approx = true} : vector<16x1xf32> -> vector<16x1xf32>
    %74 = vector.broadcast %73 : vector<16x1xf32> to vector<16x8xf32>
    %75 = arith.mulf %70, %74 : vector<16x8xf32>
    %c0_32 = arith.constant 0 : index
    %c3 = arith.constant 3 : index
    %c0_33 = arith.constant 0 : index
    %c0_34 = arith.constant 0 : index
    %76 = vector.load %arg6[%c0_32, %c3, %c0_33, %c0_34] : memref<1x4x16x8xf32, #tpu.memory_space<vmem>>, vector<1x1x16x8xf32>
    %77 = vector.shape_cast %76 : vector<1x1x16x8xf32> to vector<16x8xf32>
    %78 = vector.shape_cast %75 : vector<16x8xf32> to vector<1x1x16x8xf32>
    tpu.vector_store %arg6[%c0_32, %c3, %c0_33, %c0_34], %78 {strides = array<i32>} : memref<1x4x16x8xf32, #tpu.memory_space<vmem>>, vector<1x1x16x8xf32>,
    %79 = arith.truncf %75 : vector<16x8xf32> to vector<16x8xbf16>
    %80 = vector.extract_strided_slice %5 {offsets = [0, 24], sizes = [8, 8], strides = [1, 1]} : vector<8x32xbf16> to vector<8x8xbf16>
    %cst_35 = arith.constant dense<0.000000e+00> : vector<16x8xf32>
    %81 = tpu.matmul %79, %80, %cst_35 {dimension_numbers = #tpu.dot_dimension_numbers<[1], [0], [0], [1], [0, 0, 1, 1], [], []>} : vector<16x8xbf16>, vector<8x8xbf16>, vector<16x8xf32> -> vector<16x8xf32>
    %82 = tpu.concatenate %24, %43, %62, %81 in 1 : vector<16x8xf32>, vector<16x8xf32>, vector<16x8xf32>, vector<16x8xf32> -> vector<16x32xf32>
    %83 = arith.truncf %82 : vector<16x32xf32> to vector<16x32xbf16>
    %c0_36 = arith.constant 0 : index
    %c0_37 = arith.constant 0 : index
    %c0_38 = arith.constant 0 : index
    %84 = vector.load %arg5[%c0_36, %c0_37, %c0_38] : memref<1x16x32xbf16, #tpu.memory_space<vmem>>, vector<1x16x32xbf16>
    %85 = vector.shape_cast %84 : vector<1x16x32xbf16> to vector<16x32xbf16>
    %86 = vector.shape_cast %83 : vector<16x32xbf16> to vector<1x16x32xbf16>
    tpu.vector_store %arg5[%c0_36, %c0_37, %c0_38], %86 {strides = array<i32>} : memref<1x16x32xbf16, #tpu.memory_space<vmem>>, vector<1x16x32xbf16>,
    return
  }
  func.func @transform_0(%arg0: i32, %arg1: i32) -> (i32, i32, i32) {
    %c0_i32 = arith.constant 0 : i32
    %c0_i32_0 = arith.constant 0 : i32
    return %arg0, %arg1, %c0_i32 : i32, i32, i32
  }
  func.func @transform_1(%arg0: i32, %arg1: i32) -> (i32, i32, i32) {
    %c0_i32 = arith.constant 0 : i32
    %c0_i32_0 = arith.constant 0 : i32
    %c0_i32_1 = arith.constant 0 : i32
    return %arg0, %c0_i32, %c0_i32_0 : i32, i32, i32
  }
  func.func @transform_2(%arg0: i32, %arg1: i32) -> (i32, i32, i32) {
    %c0_i32 = arith.constant 0 : i32
    %c0_i32_0 = arith.constant 0 : i32
    %c0_i32_1 = arith.constant 0 : i32
    return %arg0, %c0_i32, %c0_i32_0 : i32, i32, i32
  }
  func.func @transform_3(%arg0: i32, %arg1: i32) -> (i32, i32, i32) {
    %c0_i32 = arith.constant 0 : i32
    %c0_i32_0 = arith.constant 0 : i32
    return %arg0, %arg1, %c0_i32 : i32, i32, i32
  }
  func.func @transform_4(%arg0: i32, %arg1: i32) -> (i32, i32, i32, i32) {
    %c0_i32 = arith.constant 0 : i32
    %c0_i32_0 = arith.constant 0 : i32
    %c0_i32_1 = arith.constant 0 : i32
    return %arg0, %c0_i32, %arg1, %c0_i32_0 : i32, i32, i32, i32
  }
}

module attributes {stable_mosaic.version = 11 : i64} {
  func.func @_q_proj_rope_kernel(%arg0: i32, %arg1: i32, %arg2: memref<1x32x16xf32, #tpu.memory_space<vmem>>, %arg3: memref<32x32xf32, #tpu.memory_space<vmem>>, %arg4: memref<32x32xf32, #tpu.memory_space<vmem>>, %arg5: memref<1x32xf32, #tpu.memory_space<vmem>>, %arg6: memref<1x32xf32, #tpu.memory_space<vmem>>, %arg7: memref<16x32xf32, #tpu.memory_space<vmem>>, %arg8: memref<16x32xf32, #tpu.memory_space<vmem>>, %arg9: memref<1x16x32xbf16, #tpu.memory_space<vmem>>) attributes {dimension_semantics = [#tpu.dimension_semantics<parallel>, #tpu.dimension_semantics<parallel>], iteration_bounds = array<i64: 2, 1>, scalar_prefetch = 0 : i64, scratch_operands = 0 : i64, tpu.core_type = #tpu.core_type<tc>, window_params = [{transform_indices = @transform_0, window_bounds = array<i64: 1, 32, 16>}, {pipeline_mode = #tpu.pipeline_mode<synchronous>, transform_indices = @transform_1, window_bounds = array<i64: 32, 32>}, {pipeline_mode = #tpu.pipeline_mode<synchronous>, transform_indices = @transform_2, window_bounds = array<i64: 32, 32>}, {pipeline_mode = #tpu.pipeline_mode<synchronous>, transform_indices = @transform_3, window_bounds = array<i64: 1, 32>}, {pipeline_mode = #tpu.pipeline_mode<synchronous>, transform_indices = @transform_4, window_bounds = array<i64: 1, 32>}, {transform_indices = @transform_5, window_bounds = array<i64: 16, 32>}, {transform_indices = @transform_6, window_bounds = array<i64: 16, 32>}, {transform_indices = @transform_7, window_bounds = array<i64: 1, 16, 32>}]} {
    %c0 = arith.constant 0 : index
    %c0_0 = arith.constant 0 : index
    %c0_1 = arith.constant 0 : index
    %0 = vector.load %arg2[%c0, %c0_0, %c0_1] : memref<1x32x16xf32, #tpu.memory_space<vmem>>, vector<1x32x16xf32>
    %1 = vector.shape_cast %0 : vector<1x32x16xf32> to vector<32x16xf32>
    %2 = tpu.transpose %1, [1, 0] : vector<32x16xf32> -> vector<16x32xf32>
    %c0_2 = arith.constant 0 : index
    %c0_3 = arith.constant 0 : index
    %3 = vector.load %arg3[%c0_2, %c0_3] : memref<32x32xf32, #tpu.memory_space<vmem>>, vector<32x32xf32>
    %c0_4 = arith.constant 0 : index
    %c0_5 = arith.constant 0 : index
    %4 = vector.load %arg4[%c0_4, %c0_5] : memref<32x32xf32, #tpu.memory_space<vmem>>, vector<32x32xf32>
    %5 = arith.truncf %2 : vector<16x32xf32> to vector<16x32xbf16>
    %6 = arith.truncf %3 : vector<32x32xf32> to vector<32x32xbf16>
    %7 = arith.truncf %4 : vector<32x32xf32> to vector<32x32xbf16>
    %cst = arith.constant dense<0.000000e+00> : vector<16x32xf32>
    %8 = tpu.matmul %5, %6, %cst {dimension_numbers = #tpu.dot_dimension_numbers<[1], [0], [0], [1], [0, 0, 1, 1], [], []>} : vector<16x32xbf16>, vector<32x32xbf16>, vector<16x32xf32> -> vector<16x32xf32>
    %c0_6 = arith.constant 0 : index
    %c0_7 = arith.constant 0 : index
    %9 = vector.load %arg5[%c0_6, %c0_7] : memref<1x32xf32, #tpu.memory_space<vmem>>, vector<1x32xf32>
    %10 = vector.broadcast %9 : vector<1x32xf32> to vector<16x32xf32>
    %11 = arith.addf %8, %10 : vector<16x32xf32>
    %cst_8 = arith.constant dense<0.000000e+00> : vector<16x32xf32>
    %12 = tpu.matmul %5, %7, %cst_8 {dimension_numbers = #tpu.dot_dimension_numbers<[1], [0], [0], [1], [0, 0, 1, 1], [], []>} : vector<16x32xbf16>, vector<32x32xbf16>, vector<16x32xf32> -> vector<16x32xf32>
    %c0_9 = arith.constant 0 : index
    %c0_10 = arith.constant 0 : index
    %13 = vector.load %arg6[%c0_9, %c0_10] : memref<1x32xf32, #tpu.memory_space<vmem>>, vector<1x32xf32>
    %14 = vector.broadcast %13 : vector<1x32xf32> to vector<16x32xf32>
    %15 = arith.addf %12, %14 : vector<16x32xf32>
    %c0_11 = arith.constant 0 : index
    %c0_12 = arith.constant 0 : index
    %16 = vector.load %arg7[%c0_11, %c0_12] : memref<16x32xf32, #tpu.memory_space<vmem>>, vector<16x32xf32>
    %17 = arith.mulf %11, %16 : vector<16x32xf32>
    %c0_13 = arith.constant 0 : index
    %c0_14 = arith.constant 0 : index
    %18 = vector.load %arg8[%c0_13, %c0_14] : memref<16x32xf32, #tpu.memory_space<vmem>>, vector<16x32xf32>
    %19 = arith.mulf %15, %18 : vector<16x32xf32>
    %20 = arith.addf %17, %19 : vector<16x32xf32>
    %21 = arith.truncf %20 : vector<16x32xf32> to vector<16x32xbf16>
    %c0_15 = arith.constant 0 : index
    %c0_16 = arith.constant 0 : index
    %c0_17 = arith.constant 0 : index
    %22 = vector.load %arg9[%c0_15, %c0_16, %c0_17] : memref<1x16x32xbf16, #tpu.memory_space<vmem>>, vector<1x16x32xbf16>
    %23 = vector.shape_cast %22 : vector<1x16x32xbf16> to vector<16x32xbf16>
    %24 = vector.shape_cast %21 : vector<16x32xbf16> to vector<1x16x32xbf16>
    tpu.vector_store %arg9[%c0_15, %c0_16, %c0_17], %24 {strides = array<i32>} : memref<1x16x32xbf16, #tpu.memory_space<vmem>>, vector<1x16x32xbf16>,
    return
  }
  func.func @transform_0(%arg0: i32, %arg1: i32) -> (i32, i32, i32) {
    %c0_i32 = arith.constant 0 : i32
    %c0_i32_0 = arith.constant 0 : i32
    return %arg0, %c0_i32, %arg1 : i32, i32, i32
  }
  func.func @transform_1(%arg0: i32, %arg1: i32) -> (i32, i32) {
    %c0_i32 = arith.constant 0 : i32
    %c0_i32_0 = arith.constant 0 : i32
    %c0_i32_1 = arith.constant 0 : i32
    return %c0_i32, %c0_i32_0 : i32, i32
  }
  func.func @transform_2(%arg0: i32, %arg1: i32) -> (i32, i32) {
    %c0_i32 = arith.constant 0 : i32
    %c0_i32_0 = arith.constant 0 : i32
    %c0_i32_1 = arith.constant 0 : i32
    return %c0_i32, %c0_i32_0 : i32, i32
  }
  func.func @transform_3(%arg0: i32, %arg1: i32) -> (i32, i32) {
    %c0_i32 = arith.constant 0 : i32
    %c0_i32_0 = arith.constant 0 : i32
    %c0_i32_1 = arith.constant 0 : i32
    return %c0_i32, %c0_i32_0 : i32, i32
  }
  func.func @transform_4(%arg0: i32, %arg1: i32) -> (i32, i32) {
    %c0_i32 = arith.constant 0 : i32
    %c0_i32_0 = arith.constant 0 : i32
    %c0_i32_1 = arith.constant 0 : i32
    return %c0_i32, %c0_i32_0 : i32, i32
  }
  func.func @transform_5(%arg0: i32, %arg1: i32) -> (i32, i32) {
    %c0_i32 = arith.constant 0 : i32
    %c0_i32_0 = arith.constant 0 : i32
    return %arg1, %c0_i32 : i32, i32
  }
  func.func @transform_6(%arg0: i32, %arg1: i32) -> (i32, i32) {
    %c0_i32 = arith.constant 0 : i32
    %c0_i32_0 = arith.constant 0 : i32
    return %arg1, %c0_i32 : i32, i32
  }
  func.func @transform_7(%arg0: i32, %arg1: i32) -> (i32, i32, i32) {
    %c0_i32 = arith.constant 0 : i32
    %c0_i32_0 = arith.constant 0 : i32
    return %arg0, %arg1, %c0_i32 : i32, i32, i32
  }
}

module attributes {stable_mosaic.version = 11 : i64} {
  func.func @_kv_proj_rope_kernel(%arg0: i32, %arg1: i32, %arg2: memref<1x32x8xf32, #tpu.memory_space<vmem>>, %arg3: memref<32x32xf32, #tpu.memory_space<vmem>>, %arg4: memref<32x32xf32, #tpu.memory_space<vmem>>, %arg5: memref<32x32xf32, #tpu.memory_space<vmem>>, %arg6: memref<1x32xf32, #tpu.memory_space<vmem>>, %arg7: memref<1x32xf32, #tpu.memory_space<vmem>>, %arg8: memref<1x32xf32, #tpu.memory_space<vmem>>, %arg9: memref<8x32xf32, #tpu.memory_space<vmem>>, %arg10: memref<8x32xf32, #tpu.memory_space<vmem>>, %arg11: memref<1x8x32xbf16, #tpu.memory_space<vmem>>, %arg12: memref<1x8x32xbf16, #tpu.memory_space<vmem>>) attributes {dimension_semantics = [#tpu.dimension_semantics<parallel>, #tpu.dimension_semantics<parallel>], iteration_bounds = array<i64: 2, 1>, scalar_prefetch = 0 : i64, scratch_operands = 0 : i64, tpu.core_type = #tpu.core_type<tc>, window_params = [{transform_indices = @transform_0, window_bounds = array<i64: 1, 32, 8>}, {pipeline_mode = #tpu.pipeline_mode<synchronous>, transform_indices = @transform_1, window_bounds = array<i64: 32, 32>}, {pipeline_mode = #tpu.pipeline_mode<synchronous>, transform_indices = @transform_2, window_bounds = array<i64: 32, 32>}, {pipeline_mode = #tpu.pipeline_mode<synchronous>, transform_indices = @transform_3, window_bounds = array<i64: 32, 32>}, {pipeline_mode = #tpu.pipeline_mode<synchronous>, transform_indices = @transform_4, window_bounds = array<i64: 1, 32>}, {pipeline_mode = #tpu.pipeline_mode<synchronous>, transform_indices = @transform_5, window_bounds = array<i64: 1, 32>}, {pipeline_mode = #tpu.pipeline_mode<synchronous>, transform_indices = @transform_6, window_bounds = array<i64: 1, 32>}, {transform_indices = @transform_7, window_bounds = array<i64: 8, 32>}, {transform_indices = @transform_8, window_bounds = array<i64: 8, 32>}, {transform_indices = @transform_9, window_bounds = array<i64: 1, 8, 32>}, {transform_indices = @transform_10, window_bounds = array<i64: 1, 8, 32>}]} {
    %c0 = arith.constant 0 : index
    %c0_0 = arith.constant 0 : index
    %c0_1 = arith.constant 0 : index
    %0 = vector.load %arg2[%c0, %c0_0, %c0_1] : memref<1x32x8xf32, #tpu.memory_space<vmem>>, vector<1x32x8xf32>
    %1 = vector.shape_cast %0 : vector<1x32x8xf32> to vector<32x8xf32>
    %2 = tpu.transpose %1, [1, 0] : vector<32x8xf32> -> vector<8x32xf32>
    %c0_2 = arith.constant 0 : index
    %c0_3 = arith.constant 0 : index
    %3 = vector.load %arg3[%c0_2, %c0_3] : memref<32x32xf32, #tpu.memory_space<vmem>>, vector<32x32xf32>
    %c0_4 = arith.constant 0 : index
    %c0_5 = arith.constant 0 : index
    %4 = vector.load %arg4[%c0_4, %c0_5] : memref<32x32xf32, #tpu.memory_space<vmem>>, vector<32x32xf32>
    %c0_6 = arith.constant 0 : index
    %c0_7 = arith.constant 0 : index
    %5 = vector.load %arg5[%c0_6, %c0_7] : memref<32x32xf32, #tpu.memory_space<vmem>>, vector<32x32xf32>
    %6 = arith.truncf %2 : vector<8x32xf32> to vector<8x32xbf16>
    %7 = arith.truncf %3 : vector<32x32xf32> to vector<32x32xbf16>
    %8 = arith.truncf %4 : vector<32x32xf32> to vector<32x32xbf16>
    %9 = arith.truncf %5 : vector<32x32xf32> to vector<32x32xbf16>
    %cst = arith.constant dense<0.000000e+00> : vector<8x32xf32>
    %10 = tpu.matmul %6, %7, %cst {dimension_numbers = #tpu.dot_dimension_numbers<[1], [0], [0], [1], [0, 0, 1, 1], [], []>} : vector<8x32xbf16>, vector<32x32xbf16>, vector<8x32xf32> -> vector<8x32xf32>
    %c0_8 = arith.constant 0 : index
    %c0_9 = arith.constant 0 : index
    %11 = vector.load %arg6[%c0_8, %c0_9] : memref<1x32xf32, #tpu.memory_space<vmem>>, vector<1x32xf32>
    %12 = vector.broadcast %11 : vector<1x32xf32> to vector<8x32xf32>
    %13 = arith.addf %10, %12 : vector<8x32xf32>
    %cst_10 = arith.constant dense<0.000000e+00> : vector<8x32xf32>
    %14 = tpu.matmul %6, %8, %cst_10 {dimension_numbers = #tpu.dot_dimension_numbers<[1], [0], [0], [1], [0, 0, 1, 1], [], []>} : vector<8x32xbf16>, vector<32x32xbf16>, vector<8x32xf32> -> vector<8x32xf32>
    %c0_11 = arith.constant 0 : index
    %c0_12 = arith.constant 0 : index
    %15 = vector.load %arg7[%c0_11, %c0_12] : memref<1x32xf32, #tpu.memory_space<vmem>>, vector<1x32xf32>
    %16 = vector.broadcast %15 : vector<1x32xf32> to vector<8x32xf32>
    %17 = arith.addf %14, %16 : vector<8x32xf32>
    %cst_13 = arith.constant dense<0.000000e+00> : vector<8x32xf32>
    %18 = tpu.matmul %6, %9, %cst_13 {dimension_numbers = #tpu.dot_dimension_numbers<[1], [0], [0], [1], [0, 0, 1, 1], [], []>} : vector<8x32xbf16>, vector<32x32xbf16>, vector<8x32xf32> -> vector<8x32xf32>
    %c0_14 = arith.constant 0 : index
    %c0_15 = arith.constant 0 : index
    %19 = vector.load %arg8[%c0_14, %c0_15] : memref<1x32xf32, #tpu.memory_space<vmem>>, vector<1x32xf32>
    %20 = vector.broadcast %19 : vector<1x32xf32> to vector<8x32xf32>
    %21 = arith.addf %18, %20 : vector<8x32xf32>
    %c0_16 = arith.constant 0 : index
    %c0_17 = arith.constant 0 : index
    %22 = vector.load %arg9[%c0_16, %c0_17] : memref<8x32xf32, #tpu.memory_space<vmem>>, vector<8x32xf32>
    %23 = arith.mulf %13, %22 : vector<8x32xf32>
    %c0_18 = arith.constant 0 : index
    %c0_19 = arith.constant 0 : index
    %24 = vector.load %arg10[%c0_18, %c0_19] : memref<8x32xf32, #tpu.memory_space<vmem>>, vector<8x32xf32>
    %25 = arith.mulf %17, %24 : vector<8x32xf32>
    %26 = arith.addf %23, %25 : vector<8x32xf32>
    %27 = arith.truncf %26 : vector<8x32xf32> to vector<8x32xbf16>
    %c0_20 = arith.constant 0 : index
    %c0_21 = arith.constant 0 : index
    %c0_22 = arith.constant 0 : index
    %28 = vector.load %arg11[%c0_20, %c0_21, %c0_22] : memref<1x8x32xbf16, #tpu.memory_space<vmem>>, vector<1x8x32xbf16>
    %29 = vector.shape_cast %28 : vector<1x8x32xbf16> to vector<8x32xbf16>
    %30 = vector.shape_cast %27 : vector<8x32xbf16> to vector<1x8x32xbf16>
    tpu.vector_store %arg11[%c0_20, %c0_21, %c0_22], %30 {strides = array<i32>} : memref<1x8x32xbf16, #tpu.memory_space<vmem>>, vector<1x8x32xbf16>,
    %31 = arith.truncf %21 : vector<8x32xf32> to vector<8x32xbf16>
    %c0_23 = arith.constant 0 : index
    %c0_24 = arith.constant 0 : index
    %c0_25 = arith.constant 0 : index
    %32 = vector.load %arg12[%c0_23, %c0_24, %c0_25] : memref<1x8x32xbf16, #tpu.memory_space<vmem>>, vector<1x8x32xbf16>
    %33 = vector.shape_cast %32 : vector<1x8x32xbf16> to vector<8x32xbf16>
    %34 = vector.shape_cast %31 : vector<8x32xbf16> to vector<1x8x32xbf16>
    tpu.vector_store %arg12[%c0_23, %c0_24, %c0_25], %34 {strides = array<i32>} : memref<1x8x32xbf16, #tpu.memory_space<vmem>>, vector<1x8x32xbf16>,
    return
  }
  func.func @transform_0(%arg0: i32, %arg1: i32) -> (i32, i32, i32) {
    %c0_i32 = arith.constant 0 : i32
    %c0_i32_0 = arith.constant 0 : i32
    return %arg0, %c0_i32, %arg1 : i32, i32, i32
  }
  func.func @transform_1(%arg0: i32, %arg1: i32) -> (i32, i32) {
    %c0_i32 = arith.constant 0 : i32
    %c0_i32_0 = arith.constant 0 : i32
    %c0_i32_1 = arith.constant 0 : i32
    return %c0_i32, %c0_i32_0 : i32, i32
  }
  func.func @transform_2(%arg0: i32, %arg1: i32) -> (i32, i32) {
    %c0_i32 = arith.constant 0 : i32
    %c0_i32_0 = arith.constant 0 : i32
    %c0_i32_1 = arith.constant 0 : i32
    return %c0_i32, %c0_i32_0 : i32, i32
  }
  func.func @transform_3(%arg0: i32, %arg1: i32) -> (i32, i32) {
    %c0_i32 = arith.constant 0 : i32
    %c0_i32_0 = arith.constant 0 : i32
    %c0_i32_1 = arith.constant 0 : i32
    return %c0_i32, %c0_i32_0 : i32, i32
  }
  func.func @transform_4(%arg0: i32, %arg1: i32) -> (i32, i32) {
    %c0_i32 = arith.constant 0 : i32
    %c0_i32_0 = arith.constant 0 : i32
    %c0_i32_1 = arith.constant 0 : i32
    return %c0_i32, %c0_i32_0 : i32, i32
  }
  func.func @transform_5(%arg0: i32, %arg1: i32) -> (i32, i32) {
    %c0_i32 = arith.constant 0 : i32
    %c0_i32_0 = arith.constant 0 : i32
    %c0_i32_1 = arith.constant 0 : i32
    return %c0_i32, %c0_i32_0 : i32, i32
  }
  func.func @transform_6(%arg0: i32, %arg1: i32) -> (i32, i32) {
    %c0_i32 = arith.constant 0 : i32
    %c0_i32_0 = arith.constant 0 : i32
    %c0_i32_1 = arith.constant 0 : i32
    return %c0_i32, %c0_i32_0 : i32, i32
  }
  func.func @transform_7(%arg0: i32, %arg1: i32) -> (i32, i32) {
    %c0_i32 = arith.constant 0 : i32
    %c0_i32_0 = arith.constant 0 : i32
    return %arg1, %c0_i32 : i32, i32
  }
  func.func @transform_8(%arg0: i32, %arg1: i32) -> (i32, i32) {
    %c0_i32 = arith.constant 0 : i32
    %c0_i32_0 = arith.constant 0 : i32
    return %arg1, %c0_i32 : i32, i32
  }
  func.func @transform_9(%arg0: i32, %arg1: i32) -> (i32, i32, i32) {
    %c0_i32 = arith.constant 0 : i32
    %c0_i32_0 = arith.constant 0 : i32
    return %arg0, %arg1, %c0_i32 : i32, i32, i32
  }
  func.func @transform_10(%arg0: i32, %arg1: i32) -> (i32, i32, i32) {
    %c0_i32 = arith.constant 0 : i32
    %c0_i32_0 = arith.constant 0 : i32
    return %arg0, %arg1, %c0_i32 : i32, i32, i32
  }
}

module attributes {stable_mosaic.version = 11 : i64} {
  func.func @_out_proj_kernel(%arg0: i32, %arg1: i32, %arg2: memref<1x16x32xbf16, #tpu.memory_space<vmem>>, %arg3: memref<32x32xf32, #tpu.memory_space<vmem>>, %arg4: memref<1x32xf32, #tpu.memory_space<vmem>>, %arg5: memref<1x32x16xf32, #tpu.memory_space<vmem>>) attributes {dimension_semantics = [#tpu.dimension_semantics<parallel>, #tpu.dimension_semantics<parallel>], iteration_bounds = array<i64: 2, 1>, scalar_prefetch = 0 : i64, scratch_operands = 0 : i64, tpu.core_type = #tpu.core_type<tc>, window_params = [{transform_indices = @transform_0, window_bounds = array<i64: 1, 16, 32>}, {pipeline_mode = #tpu.pipeline_mode<synchronous>, transform_indices = @transform_1, window_bounds = array<i64: 32, 32>}, {pipeline_mode = #tpu.pipeline_mode<synchronous>, transform_indices = @transform_2, window_bounds = array<i64: 1, 32>}, {transform_indices = @transform_3, window_bounds = array<i64: 1, 32, 16>}]} {
    %c0 = arith.constant 0 : index
    %c0_0 = arith.constant 0 : index
    %c0_1 = arith.constant 0 : index
    %0 = vector.load %arg2[%c0, %c0_0, %c0_1] : memref<1x16x32xbf16, #tpu.memory_space<vmem>>, vector<1x16x32xbf16>
    %1 = vector.shape_cast %0 : vector<1x16x32xbf16> to vector<16x32xbf16>
    %c0_2 = arith.constant 0 : index
    %c0_3 = arith.constant 0 : index
    %2 = vector.load %arg3[%c0_2, %c0_3] : memref<32x32xf32, #tpu.memory_space<vmem>>, vector<32x32xf32>
    %3 = arith.truncf %2 : vector<32x32xf32> to vector<32x32xbf16>
    %cst = arith.constant dense<0.000000e+00> : vector<16x32xf32>
    %4 = tpu.matmul %1, %3, %cst {dimension_numbers = #tpu.dot_dimension_numbers<[1], [0], [0], [1], [0, 0, 1, 1], [], []>} : vector<16x32xbf16>, vector<32x32xbf16>, vector<16x32xf32> -> vector<16x32xf32>
    %c0_4 = arith.constant 0 : index
    %c0_5 = arith.constant 0 : index
    %5 = vector.load %arg4[%c0_4, %c0_5] : memref<1x32xf32, #tpu.memory_space<vmem>>, vector<1x32xf32>
    %6 = vector.broadcast %5 : vector<1x32xf32> to vector<16x32xf32>
    %7 = arith.addf %4, %6 : vector<16x32xf32>
    %8 = tpu.transpose %7, [1, 0] : vector<16x32xf32> -> vector<32x16xf32>
    %c0_6 = arith.constant 0 : index
    %c0_7 = arith.constant 0 : index
    %c0_8 = arith.constant 0 : index
    %9 = vector.load %arg5[%c0_6, %c0_7, %c0_8] : memref<1x32x16xf32, #tpu.memory_space<vmem>>, vector<1x32x16xf32>
    %10 = vector.shape_cast %9 : vector<1x32x16xf32> to vector<32x16xf32>
    %11 = vector.shape_cast %8 : vector<32x16xf32> to vector<1x32x16xf32>
    tpu.vector_store %arg5[%c0_6, %c0_7, %c0_8], %11 {strides = array<i32>} : memref<1x32x16xf32, #tpu.memory_space<vmem>>, vector<1x32x16xf32>,
    return
  }
  func.func @transform_0(%arg0: i32, %arg1: i32) -> (i32, i32, i32) {
    %c0_i32 = arith.constant 0 : i32
    %c0_i32_0 = arith.constant 0 : i32
    return %arg0, %arg1, %c0_i32 : i32, i32, i32
  }
  func.func @transform_1(%arg0: i32, %arg1: i32) -> (i32, i32) {
    %c0_i32 = arith.constant 0 : i32
    %c0_i32_0 = arith.constant 0 : i32
    %c0_i32_1 = arith.constant 0 : i32
    return %c0_i32, %c0_i32_0 : i32, i32
  }
  func.func @transform_2(%arg0: i32, %arg1: i32) -> (i32, i32) {
    %c0_i32 = arith.constant 0 : i32
    %c0_i32_0 = arith.constant 0 : i32
    %c0_i32_1 = arith.constant 0 : i32
    return %c0_i32, %c0_i32_0 : i32, i32
  }
  func.func @transform_3(%arg0: i32, %arg1: i32) -> (i32, i32, i32) {
    %c0_i32 = arith.constant 0 : i32
    %c0_i32_0 = arith.constant 0 : i32
    return %arg0, %c0_i32, %arg1 : i32, i32, i32
  }
}

</mosaic_0001>

<bundles_post_ra>
// kernel: tile.34
= control target key start
LH: loop header
LB: loop body
LE: loop exit
PB: predicated region body
PF: predicated region fallthrough
CT: control target
= control target key end

     0   :  { %vm42_vm0 = vcmask 1047556   ;;  %vm44_vm1 = vcmask 64512   ;;  %s93_s22 = smov 8   ;;  %s94_s25 = smov 16   ;;  %vm54_vm2 = vcmask 261312   ;;  %vm64_vm3 = vcmask 195712   ;;  %s146_s0 = inlined_call_operand.vmem [shape: f32[8,4,8], index: 0, kind: input, shape index: {}]   ;;  %s147_s1 = inlined_call_operand.vmem [shape: f32[8,32], index: 1, kind: output, shape index: {}]  }
   0x1   :  { %v82_v0 = vld [vmem:[%s146_s0 + $0x1c] sm:$0xf]  ;;  %v83_v1 = vld [vmem:[%s146_s0 + $0x18] sm:$0xf]  ;;  %v84_v2 = vld [vmem:[%s146_s0 + $0x14] sm:$0xf] }
   0x2   :  { %8 = vst [vmem:[#allocation0 + $0x38] sm:$0xf] %v82_v0  ;;  %13 = vst [vmem:[#allocation0 + $0x30] sm:$0xf] %v83_v1  ;;  %v85_v3 = vld [vmem:[%s146_s0 + $0x10] sm:$0xf] }
   0x3   :  { %18 = vst [vmem:[#allocation0 + $0x28] sm:$0xf] %v84_v2  ;;  %v86_v4 = vld [vmem:[%s146_s0 + $0xc] sm:$0xf]  ;;  %v87_v5 = vld [vmem:[%s146_s0 + $0x8] sm:$0xf] }
   0x4   :  { %23 = vst [vmem:[#allocation0 + $0x20] sm:$0xf] %v85_v3  ;;  %28 = vst [vmem:[#allocation0 + $0x18] sm:$0xf] %v86_v4  ;;  %v88_v6 = vld [vmem:[%s146_s0 + $0x4] sm:$0xf] }
   0x5   :  { %33 = vst [vmem:[#allocation0 + $0x10] sm:$0xf] %v87_v5  ;;  %v38_v7 = vld [vmem:[%s146_s0] sm:$0xf]  ;;  %37 = vst [vmem:[#allocation0 + $0x8] sm:$0xf] %v88_v6 }
   0x6   :  { %39 = vst [vmem:[#allocation0] sm:$0xf] %v38_v7  ;;  %s92_s0 = smov 24   ;;  %vm74_vm4 = vcmask 130112  }
   0xb   :  { %v49_v8 = vld [vmem:[#allocation0 + $0x3] ss:$8 sm:$0xf0]   ;;  %v59_v9 = vld [vmem:[#allocation0 + $0x2] ss:$8 sm:$0xf0]  }
   0xc   :  { %v69_v14 = vld [vmem:[#allocation0 + $0x1] ss:$8 sm:$0xf0]   ;;  %v41_v17 = vld [vmem:[#allocation0] ss:$8 sm:$0xf0]  }
   0xd   :  { %v47_v10 = vld [vmem:[#allocation0 + $0x3] ss:$8 sm:$0xf]   ;;  %v57_v11 = vld [vmem:[#allocation0 + $0x2] ss:$8 sm:$0xf]  }
   0xe   :  { %v51_v12 = vsel %vm42_vm0, %v49_v8, %v47_v10  ;;  %v67_v13 = vld [vmem:[#allocation0 + $0x1] ss:$8 sm:$0xf]   ;;  %v40_v16 = vld [vmem:[#allocation0] ss:$8 sm:$0xf]   ;;  %v61_v18 = vsel %vm42_vm0, %v59_v9, %v57_v11 }
   0xf   :  { %52 = vrot.lane.b32.xlu0 %v51_v12, %s92_s0  ;;  %v71_v15 = vsel %vm42_vm0, %v69_v14, %v67_v13  ;;  %v43_v19 = vsel %vm42_vm0, %v41_v17, %v40_v16 }
  0x10   :  { %72 = vrot.lane.b32.xlu1 %v71_v15, %s93_s22  ;;  %45 = vst.msk [vmem:[%s147_s1] sm:$0xff] %vm44_vm1, %v43_v19  }
  0x13   :  { %62 = vrot.lane.b32.xlu0 %v61_v18, %s94_s25 }
  0x81   :  { %v53_v20 = vpop.permute.xlu0 %52  }
  0x82   :  { %55 = vst.msk [vmem:[%s147_s1] sm:$0xff] %vm54_vm2, %v53_v20   ;;  %v73_v21 = vpop.permute.xlu1 %72  }
  0x85   :  { %v63_v22 = vpop.permute.xlu0 %62  }
  0x86   :  { %65 = vst.msk [vmem:[%s147_s1] sm:$0xff] %vm64_vm3, %v63_v22  }
  0x87   :  { %75 = vst.msk [vmem:[%s147_s1] sm:$0xff] %vm74_vm4, %v73_v21  }

// kernel: multi_head_attention_cross.4
= control target key start
LH: loop header
LB: loop body
LE: loop exit
PB: predicated region body
PF: predicated region fallthrough
CT: control target
= control target key end

     0   :  { %s782_s24 = smov 0   ;;  %s784_s25 = smov 0   ;;  %s861_s0 = inlined_call_operand.vmem [shape: f32[2,32,16], index: 0, kind: input, shape index: {}]   ;;  %s862_s1 = inlined_call_operand.vmem [shape: f32[32,32], index: 1, kind: input, shape index: {}]   ;;  %s863_s2 = inlined_call_operand.vmem [shape: f32[32,32], index: 2, kind: input, shape index: {}]   ;;  %s864_s3 = inlined_call_operand.vmem [shape: f32[1,32], index: 3, kind: input, shape index: {}]   ;;  %s865_s4 = inlined_call_operand.vmem [shape: f32[1,32], index: 4, kind: input, shape index: {}]   ;;  %s866_s5 = inlined_call_operand.vmem [shape: f32[16,32], index: 5, kind: input, shape index: {}]   ;;  %s867_s6 = inlined_call_operand.vmem [shape: f32[16,32], index: 6, kind: input, shape index: {}]   ;;  %s868_s7 = inlined_call_operand.vmem [shape: bf16[2,16,32], index: 7, kind: output, shape index: {}]  }
   0x1   :  { %s786_s26 = smov 0  }
   0x2 LB: > { %s29_s27 = sadd.s32 1, %s734_s25  ;;  %p651_p0 = scmp.ge.s32.totalorder %s738_s26, 1  ;;  %s738_s26 = sphi %s786_s26, %s17_s26   ;;  %s734_s25 = sphi %s784_s25, %s870_s25   ;;  %s730_s24 = sphi %s782_s24, %s869_s24  }
   0x3   : > { %p31_p1 = scmp.ge.s32.totalorder %s29_s27, 2  ;;  %p278_p2 = scmp.lt.s32.totalorder %s738_s26, 3 }
   0x5   : > { %s872_s27 = smov (%p31_p1, %s29_s27), 0  ;;  %p279_p3 = pnand %p651_p0, %p278_p2 }
   0x6   : > { %p327_p4 = scmp.lt.s32.totalorder (!%p279_p3), %s730_s24, 1  ;;  %v394_v0 = vld [vmem:[%s862_s1] sm:$0xff] (!%p279_p3)  ;;  %v395_v1 = vld [vmem:[%s862_s1 + $0x8] sm:$0xff] (!%p279_p3)  ;;  %v740_v3 = vmov (!%p279_p3), 0.0   ;;  %v396_v8 = vld [vmem:[%s862_s1 + $0x10] sm:$0xff] (!%p279_p3)  ;;  %vm741_vm0 = vmmov (!%p279_p3), 0  }
   0x7   : > { %282 = sbr.rel (%p279_p3) target bundleno = 376 (0x178), region = 48  ;;  %v398_v2 = vld [vmem:[%s863_s2] sm:$0xff] (!%p279_p3)  ;;  %674 = vmatprep.subr.bf16.mxu0 (!%p279_p3), %v740_v3  ;;  %682 = vmatprep.subr.bf16.mxu1 (!%p279_p3), %v740_v3  ;;  %v403_v4 = vpack.c.bf16 (!%p279_p3), %v395_v1, %v394_v0  ;;  %v399_v5 = vld [vmem:[%s863_s2 + $0x8] sm:$0xff] (!%p279_p3)  ;;  %v397_v9 = vld [vmem:[%s862_s1 + $0x18] sm:$0xff] (!%p279_p3)  ;;  %vm414_vm1 = vcmask (!%p279_p3), 261120   ;;  %vm525_vm2 = vcmask (!%p279_p3), 257024  }
   0x8   : > { %v405_v6 = vpack.c.bf16 (!%p279_p3), %v399_v5, %v398_v2  ;;  %v404_v11 = vpack.c.bf16 (!%p279_p3), %v397_v9, %v396_v8  ;;  %v400_v12 = vld [vmem:[%s863_s2 + $0x10] sm:$0xff] (!%p279_p3)  ;;  %v401_v13 = vld [vmem:[%s863_s2 + $0x18] sm:$0xff] (!%p279_p3)  ;;  %678 = vmatprep.mubr.msk.bf16.mxu0 (!%p279_p3), %vm741_vm0, %v740_v3  ;;  %686 = vmatprep.mubr.msk.bf16.mxu1 (!%p279_p3), %vm741_vm0, %v740_v3  ;;  %v656_v20 = vld [vmem:[%s864_s3] ss:$0 sm:$0xff] (!%p279_p3) }
   0x9   : > { %675 = vmatpush3.bf16.msra.mxu0 (!%p279_p3), %v403_v4  ;;  %v406_v14 = vpack.c.bf16 (!%p279_p3), %v401_v13, %v400_v12  ;;  %v658_v21 = vld [vmem:[%s865_s4] ss:$0 sm:$0xff] (!%p279_p3)  ;;  %v508_v31 = vld [vmem:[%s866_s5 + $0x8] sm:$0xff] (!%p279_p3) }
   0xa   : > { %683 = vmatpush3.bf16.msra.mxu1 (!%p279_p3), %v405_v6  ;;  %676 = vmatprep.subr.bf16.mxu0 (!%p279_p3), %v740_v3  ;;  %v507_v23 = vld [vmem:[%s866_s5] sm:$0xff] (!%p279_p3)  ;;  %v512_v33 = vld [vmem:[%s867_s6 + $0x8] sm:$0xff] (!%p279_p3) }
   0xb   : > { %684 = vmatprep.subr.bf16.mxu1 (!%p279_p3), %v740_v3  ;;  %v511_v25 = vld [vmem:[%s867_s6] sm:$0xff] (!%p279_p3) }
   0xd   : > { %677 = vmatpush3.bf16.msra.mxu0 (!%p279_p3), %v404_v11 }
   0xe   : > { %s874_s24 = smov (!%p327_p4, %s730_s24), 1  ;;  %685 = vmatpush3.bf16.msra.mxu1 %v406_v14 }
   0xf   : > { %s664_s13 = sshll.u32 %s874_s24, 5  ;;  %s665_s18 = sshll.u32 %s874_s24, 3 }
  0x10   : > { %s334_s16 = scalar_lea.vmem %s861_s0, %s664_s13  ;;  %s355_s21 = scalar_lea.vmem %s868_s7, %s665_s18 }
  0x11   : > { %v358_v7 = vld [vmem:[%s334_s16] sm:$0xff]  ;;  %v359_v10 = vld [vmem:[%s334_s16 + $0x8] sm:$0xff]  ;;  %v360_v15 = vld [vmem:[%s334_s16 + $0x10] sm:$0xff] }
  0x12   : > { %362 = vxpose.xlu0.b32.start [1/4] (short) (narrow) %v358_v7, 16  ;;  %v361_v16 = vld [vmem:[%s334_s16 + $0x18] sm:$0xff] }
  0x16   : > { %363 = vxpose.xlu0.b32.cont [2/4] (short) (narrow) %v359_v10, 16 }
  0x1a   : > { %364 = vxpose.xlu0.b32.cont [3/4] (short) (narrow) %v360_v15, 16 }
  0x1e   : > { %365 = vxpose.xlu0.b32.end [4/4] (short) (narrow) %v361_v16, 16 }
  0x92   : > { %v378_v17 = vpop.trf.xlu0 }
  0x96   : > { %v379_v18 = vpop.trf.xlu0 }
  0x97   : > { %v402_v19 = vpack.c.bf16 %v379_v18, %v378_v17 }
  0x99   : > { %679 = vmatmul.mubr.msk.bf16.vlgmr.msra.gmra.mrb[0].mxu0 %vm414_vm1, %v402_v19  ;;  %687 = vmatmul.mubr.msk.bf16.vlgmr.msra.gmra.mrb[0].mxu1 %vm414_vm1, %v402_v19 }
 0x16c   : > { %v452_v22 = vpop.f32.mrb[0].mxu0  ;;  %v500_v24 = vpop.f32.mrb[0].mxu1 }
 0x16d   : > { %v453_v26 = vadd.f32 %v656_v20, %v452_v22  ;;  %v501_v27 = vadd.f32 %v658_v21, %v500_v24  ;;  %v680_v28 = vpop.f32.mrb[1].mxu0  ;;  %v688_v29 = vpop.f32.mrb[1].mxu1 }
 0x16e   : > { %v455_v30 = vpop.f32.mrb[2].mxu0  ;;  %v503_v32 = vpop.f32.mrb[2].mxu1 }
 0x16f   : > { %v509_v34 = vmul.f32 %v507_v23, %v453_v26  ;;  %v513_v35 = vmul.f32 %v511_v25, %v501_v27  ;;  %v456_v36 = vadd.f32 %v656_v20, %v455_v30  ;;  %v504_v37 = vadd.f32 %v658_v21, %v503_v32  ;;  %v681_v38 = vpop.f32.mrb[3].mxu0  ;;  %v689_v39 = vpop.f32.mrb[3].mxu1 }
 0x171   : > { %v515_v40 = vadd.f32 %v513_v35, %v509_v34  ;;  %v510_v41 = vmul.f32 %v508_v31, %v456_v36  ;;  %v514_v42 = vmul.f32 %v512_v33, %v504_v37 }
 0x173   : > { %v666_v43 = vpack.c.bf16 %v515_v40, %v515_v40  ;;  %v516_v44 = vadd.f32 %v514_v42, %v510_v41 }
 0x175   : > { %526 = vst.msk [vmem:[%s355_s21] sm:$0xf] %vm525_vm2, %v666_v43  ;;  %v667_v45 = vpack.c.bf16 %v516_v44, %v516_v44 }
 0x177   : > { %527 = vst.msk [vmem:[%s355_s21 + $0x4] sm:$0xf] %vm525_vm2, %v667_v45 }
 0x178 PF: > { %s17_s26 = sadd.s32 1, %s738_s26   ;;  %s869_s24 = smov %s734_s25 }
 0x179   : > { %p14_p5 = scmp.ge.s32.totalorder %s17_s26, 4   ;;  %s870_s25 = smov %s872_s27 }
 0x17b   :  { %16 = sbr.rel (!%p14_p5) target bundleno = 2 (0x2), region = 84 }

// kernel: multi_head_attention_cross.7
= control target key start
LH: loop header
LB: loop body
LE: loop exit
PB: predicated region body
PF: predicated region fallthrough
CT: control target
= control target key end

     0   :  { %s493_s12 = smov 0   ;;  %s495_s13 = smov 0   ;;  %s541_s0 = inlined_call_operand.vmem [shape: bf16[2,16,32], index: 0, kind: input, shape index: {}]   ;;  %s542_s1 = inlined_call_operand.vmem [shape: f32[32,32], index: 1, kind: input, shape index: {}]   ;;  %s543_s2 = inlined_call_operand.vmem [shape: f32[1,32], index: 2, kind: input, shape index: {}]   ;;  %s544_s3 = inlined_call_operand.vmem [shape: f32[2,32,16], index: 3, kind: output, shape index: {}]  }
   0x1   :  { %s497_s14 = smov 0  }
   0x2 LB: > { %s25_s15 = sadd.s32 1, %s465_s13  ;;  %p397_p0 = scmp.ge.s32.totalorder %s469_s14, 1  ;;  %s469_s14 = sphi %s497_s14, %s13_s14   ;;  %s465_s13 = sphi %s495_s13, %s546_s13   ;;  %s461_s12 = sphi %s493_s12, %s545_s12  }
   0x3   : > { %p27_p1 = scmp.ge.s32.totalorder %s25_s15, 2  ;;  %p158_p2 = scmp.lt.s32.totalorder %s469_s14, 3 }
   0x5   : > { %s548_s15 = smov (%p27_p1, %s25_s15), 0  ;;  %p159_p3 = pnand %p397_p0, %p158_p2 }
   0x6   : > { %v210_v0 = vld [vmem:[%s542_s1] sm:$0xff] (!%p159_p3)  ;;  %v211_v1 = vld [vmem:[%s542_s1 + $0x8] sm:$0xff] (!%p159_p3)  ;;  %v212_v2 = vld [vmem:[%s542_s1 + $0x10] sm:$0xff] (!%p159_p3)  ;;  %p190_p4 = scmp.lt.s32.totalorder (!%p159_p3), %s461_s12, 1  ;;  %v471_v3 = vmov (!%p159_p3), 0.0   ;;  %vm472_vm0 = vmmov (!%p159_p3), 0  }
   0x7   : > { %162 = sbr.rel (%p159_p3) target bundleno = 374 (0x176), region = 32  ;;  %412 = vmatprep.subr.bf16.mxu0 (!%p159_p3), %v471_v3  ;;  %v214_v4 = vpack.c.bf16 (!%p159_p3), %v211_v1, %v210_v0  ;;  %v213_v5 = vld [vmem:[%s542_s1 + $0x18] sm:$0xff] (!%p159_p3)  ;;  %416 = vmatprep.mubr.msk.bf16.mxu0 (!%p159_p3), %vm472_vm0, %v471_v3  ;;  %vm228_vm1 = vcmask (!%p159_p3), 261120   ;;  %v402_v8 = vld [vmem:[%s543_s2] ss:$0 sm:$0xff] (!%p159_p3)  ;;  %vm305_vm2 = vcmask (!%p159_p3), 130048  }
   0x8   : > { %v215_v6 = vpack.c.bf16 (!%p159_p3), %v213_v5, %v212_v2 }
   0x9   : > { %413 = vmatpush3.bf16.msra.mxu0 (!%p159_p3), %v214_v4 }
   0xa   : > { %414 = vmatprep.subr.bf16.mxu0 (!%p159_p3), %v471_v3 }
   0xd   : > { %415 = vmatpush3.bf16.msra.mxu0 (!%p159_p3), %v215_v6 }
   0xe   : > { %s550_s12 = smov (!%p190_p4, %s461_s12), 1 }
   0xf   : > { %s407_s24 = sshll.u32 %s550_s12, 3  ;;  %s408_s30 = sshll.u32 %s550_s12, 5 }
  0x10   : > { %s197_s27 = scalar_lea.vmem %s541_s0, %s407_s24  ;;  %s206_s6 = scalar_lea.vmem %s544_s3, %s408_s30 }
  0x11   : > { %v446_v7 = vld [vmem:[%s197_s27] sm:$0xff]  }
  0x12   : > { %417 = vmatmul.mubr.msk.bf16.vlgmr.msra.gmra.mrb[0].mxu0 %vm228_vm1, %v446_v7 }
  0xe5   : > { %v266_v9 = vpop.f32.mrb[0].mxu0 }
  0xe6   : > { %v418_v10 = vpop.f32.mrb[1].mxu0  ;;  %v267_v11 = vadd.f32 %v402_v8, %v266_v9 }
  0xe7   : > { %v269_v12 = vpop.f32.mrb[2].mxu0 }
  0xe8   : > { %273 = vxpose.xlu0.b32.start [1/2] (short) (narrow) %v267_v11, 32  ;;  %v419_v13 = vpop.f32.mrb[3].mxu0  ;;  %v270_v14 = vadd.f32 %v402_v8, %v269_v12 }
  0xec   : > { %274 = vxpose.xlu0.b32.end [2/2] (short) (narrow) %v270_v14, 32 }
 0x168   : > { %v289_v15 = vpop.trf.xlu0 }
 0x169   : > { %306 = vst.msk [vmem:[%s206_s6] sm:$0xff] %vm305_vm2, %v289_v15 }
 0x16c   : > { %v290_v16 = vpop.trf.xlu0 }
 0x16d   : > { %307 = vst.msk [vmem:[%s206_s6 + $0x8] sm:$0xff] %vm305_vm2, %v290_v16 }
 0x170   : > { %v291_v17 = vpop.trf.xlu0 }
 0x171   : > { %308 = vst.msk [vmem:[%s206_s6 + $0x10] sm:$0xff] %vm305_vm2, %v291_v17 }
 0x174   : > { %v292_v18 = vpop.trf.xlu0 }
 0x175   : > { %309 = vst.msk [vmem:[%s206_s6 + $0x18] sm:$0xff] %vm305_vm2, %v292_v18 }
 0x176 PF: > { %s13_s14 = sadd.s32 1, %s469_s14   ;;  %s545_s12 = smov %s465_s13 }
 0x177   : > { %p10_p5 = scmp.ge.s32.totalorder %s13_s14, 4   ;;  %s546_s13 = smov %s548_s15 }
 0x179   :  { %12 = sbr.rel (!%p10_p5) target bundleno = 2 (0x2), region = 62 }

// kernel: multi_head_attention_cross.5
= control target key start
LH: loop header
LB: loop body
LE: loop exit
PB: predicated region body
PF: predicated region fallthrough
CT: control target
= control target key end

     0   :  { %s962_s13 = smov 0   ;;  %s964_s14 = smov 0   ;;  %s1056_s0 = inlined_call_operand.vmem [shape: f32[2,32,8], index: 0, kind: input, shape index: {}]   ;;  %s1057_s1 = inlined_call_operand.vmem [shape: f32[32,32], index: 1, kind: input, shape index: {}]   ;;  %s1058_s2 = inlined_call_operand.vmem [shape: f32[32,32], index: 2, kind: input, shape index: {}]   ;;  %s1059_s3 = inlined_call_operand.vmem [shape: f32[32,32], index: 3, kind: input, shape index: {}]   ;;  %s1060_s4 = inlined_call_operand.vmem [shape: f32[1,32], index: 4, kind: input, shape index: {}]   ;;  %s1061_s5 = inlined_call_operand.vmem [shape: f32[1,32], index: 5, kind: input, shape index: {}]   ;;  %s1062_s6 = inlined_call_operand.vmem [shape: f32[1,32], index: 6, kind: input, shape index: {}]   ;;  %s1063_s7 = inlined_call_operand.vmem [shape: f32[8,32], index: 7, kind: input, shape index: {}]   ;;  %s1064_s8 = inlined_call_operand.vmem [shape: f32[8,32], index: 8, kind: input, shape index: {}]   ;;  %s1065_s9 = inlined_call_operand.vmem [shape: bf16[2,8,32], index: 9, kind: output, shape index: {0}]   ;;  %s1066_s10 = inlined_call_operand.vmem [shape: bf16[2,8,32], index: 10, kind: output, shape index: {1}]  }
   0x1   :  { %s966_s15 = smov 0  }
   0x2 LB: > { %s33_s16 = sadd.s32 1, %s899_s14  ;;  %p808_p0 = scmp.ge.s32.totalorder %s903_s15, 1  ;;  %s903_s15 = sphi %s966_s15, %s21_s15   ;;  %s899_s14 = sphi %s964_s14, %s1068_s14   ;;  %s895_s13 = sphi %s962_s13, %s1067_s13  }
   0x3   : > { %p35_p1 = scmp.ge.s32.totalorder %s33_s16, 2  ;;  %p354_p2 = scmp.lt.s32.totalorder %s903_s15, 3 }
   0x5   : > { %s1070_s16 = smov (%p35_p1, %s33_s16), 0  ;;  %p355_p3 = pnand %p808_p0, %p354_p2 }
   0x6   : > { %p412_p4 = scmp.lt.s32.totalorder (!%p355_p3), %s895_s13, 1  ;;  %v479_v0 = vld [vmem:[%s1057_s1] sm:$0xff] (!%p355_p3)  ;;  %v480_v1 = vld [vmem:[%s1057_s1 + $0x8] sm:$0xff] (!%p355_p3)  ;;  %v905_v3 = vmov (!%p355_p3), 0.0   ;;  %v481_v6 = vld [vmem:[%s1057_s1 + $0x10] sm:$0xff] (!%p355_p3)  ;;  %vm906_vm0 = vmmov (!%p355_p3), 0  }
   0x7   : > { %358 = sbr.rel (%p355_p3) target bundleno = 374 (0x176), region = 56  ;;  %v483_v2 = vld [vmem:[%s1058_s2] sm:$0xff] (!%p355_p3)  ;;  %831 = vmatprep.subr.bf16.mxu0 (!%p355_p3), %v905_v3  ;;  %v492_v4 = vpack.c.bf16 (!%p355_p3), %v480_v1, %v479_v0  ;;  %839 = vmatprep.subr.bf16.mxu1 (!%p355_p3), %v905_v3  ;;  %v484_v5 = vld [vmem:[%s1058_s2 + $0x8] sm:$0xff] (!%p355_p3)  ;;  %v482_v7 = vld [vmem:[%s1057_s1 + $0x18] sm:$0xff] (!%p355_p3)  ;;  %vm505_vm1 = vcmask (!%p355_p3), 261120   ;;  %vm649_vm2 = vcmask (!%p355_p3), 257024  }
   0x8   : > { %v494_v8 = vpack.c.bf16 (!%p355_p3), %v484_v5, %v483_v2  ;;  %v485_v9 = vld [vmem:[%s1058_s2 + $0x10] sm:$0xff] (!%p355_p3)  ;;  %v486_v10 = vld [vmem:[%s1058_s2 + $0x18] sm:$0xff] (!%p355_p3)  ;;  %v493_v11 = vpack.c.bf16 (!%p355_p3), %v482_v7, %v481_v6  ;;  %835 = vmatprep.mubr.msk.bf16.mxu0 (!%p355_p3), %vm906_vm0, %v905_v3  ;;  %843 = vmatprep.mubr.msk.bf16.mxu1 (!%p355_p3), %vm906_vm0, %v905_v3  ;;  %v487_v17 = vld [vmem:[%s1059_s3] sm:$0xff] (!%p355_p3) }
   0x9   : > { %832 = vmatpush3.bf16.msra.mxu0 (!%p355_p3), %v492_v4  ;;  %v495_v12 = vpack.c.bf16 (!%p355_p3), %v486_v10, %v485_v9  ;;  %v488_v18 = vld [vmem:[%s1059_s3 + $0x8] sm:$0xff] (!%p355_p3)  ;;  %v489_v22 = vld [vmem:[%s1059_s3 + $0x10] sm:$0xff] (!%p355_p3)  ;;  %v490_v23 = vld [vmem:[%s1059_s3 + $0x18] sm:$0xff] (!%p355_p3) }
   0xa   : > { %840 = vmatpush3.bf16.msra.mxu1 (!%p355_p3), %v494_v8  ;;  %833 = vmatprep.subr.bf16.mxu0 (!%p355_p3), %v905_v3  ;;  %v496_v20 = vpack.c.bf16 (!%p355_p3), %v488_v18, %v487_v17  ;;  %v497_v24 = vpack.c.bf16 (!%p355_p3), %v490_v23, %v489_v22  ;;  %v813_v25 = vld [vmem:[%s1060_s4] ss:$0 sm:$0xff] (!%p355_p3) }
   0xb   : > { %841 = vmatprep.subr.bf16.mxu1 (!%p355_p3), %v905_v3  ;;  %v815_v26 = vld [vmem:[%s1061_s5] ss:$0 sm:$0xff] (!%p355_p3) }
   0xc   : > { %v643_v28 = vld [vmem:[%s1063_s7] sm:$0xff] (!%p355_p3) }
   0xd   : > { %834 = vmatpush3.bf16.msra.mxu0 (!%p355_p3), %v493_v11  ;;  %v645_v30 = vld [vmem:[%s1064_s8] sm:$0xff] (!%p355_p3) }
   0xe   : > { %s1072_s13 = smov (!%p412_p4, %s895_s13), 1  ;;  %842 = vmatpush3.bf16.msra.mxu1 %v495_v12  ;;  %847 = vmatprep.subr.bf16.mxu0 %v905_v3  ;;  %v817_v42 = vld [vmem:[%s1062_s6] ss:$0 sm:$0xff] }
   0xf   : > { %s821_s17 = sshll.u32 %s1072_s13, 5  ;;  %s811_s21 = sshll.u32 %s1072_s13, 2 }
  0x10   : > { %s419_s20 = scalar_lea.vmem %s1056_s0, %s821_s17  ;;  %s434_s24 = scalar_lea.vmem %s1065_s9, %s811_s21 }
  0x11   : > { %v443_v13 = vld [vmem:[%s419_s20] sm:$0xff]  ;;  %v444_v14 = vld [vmem:[%s419_s20 + $0x8] sm:$0xff]  ;;  %v445_v15 = vld [vmem:[%s419_s20 + $0x10] sm:$0xff]  ;;  %s441_s28 = scalar_lea.vmem %s1066_s10, %s811_s21 }
  0x12   : > { %447 = vxpose.xlu0.b32.start [1/4] (short) (narrow) %v443_v13, 8  ;;  %v446_v16 = vld [vmem:[%s419_s20 + $0x18] sm:$0xff] }
  0x16   : > { %448 = vxpose.xlu0.b32.cont [2/4] (short) (narrow) %v444_v14, 8 }
  0x1a   : > { %449 = vxpose.xlu0.b32.cont [3/4] (short) (narrow) %v445_v15, 8 }
  0x1e   : > { %450 = vxpose.xlu0.b32.end [4/4] (short) (narrow) %v446_v16, 8 }
  0x92   : > { %v463_v19 = vpop.trf.xlu0 }
  0x93   : > { %v491_v21 = vpack.c.bf16 %v463_v19, %v463_v19 }
  0x95   : > { %836 = vmatmul.mubr.msk.bf16.vlgmr.msra.gmra.mrb[0].mxu0 %vm505_vm1, %v491_v21  ;;  %844 = vmatmul.mubr.msk.bf16.vlgmr.msra.gmra.mrb[0].mxu1 %vm505_vm1, %v491_v21 }
  0x96   : > { %848 = vmatpush3.bf16.msra.mxu0 %v496_v20  ;;  %851 = vmatprep.mubr.msk.bf16.mxu0 %vm906_vm0, %v905_v3 }
  0x97   : > { %849 = vmatprep.subr.bf16.mxu0 %v905_v3 }
  0x9a   : > { %850 = vmatpush3.bf16.msra.mxu0 %v497_v24 }
  0x9d   : > { %852 = vmatmul.mubr.msk.bf16.vlgmr.msra.gmra.mrb[4].mxu0 %vm505_vm1, %v491_v21 }
 0x168   : > { %v543_v27 = vpop.f32.mrb[0].mxu0  ;;  %v590_v29 = vpop.f32.mrb[0].mxu1 }
 0x169   : > { %v544_v31 = vadd.f32 %v813_v25, %v543_v27  ;;  %v591_v32 = vadd.f32 %v815_v26, %v590_v29  ;;  %v837_v33 = vpop.f32.mrb[1].mxu0  ;;  %v845_v34 = vpop.f32.mrb[1].mxu1 }
 0x16a   : > { %v546_v35 = vpop.f32.mrb[2].mxu0  ;;  %v593_v36 = vpop.f32.mrb[2].mxu1 }
 0x16b   : > { %v644_v37 = vmul.f32 %v643_v28, %v544_v31  ;;  %v646_v38 = vmul.f32 %v645_v30, %v591_v32  ;;  %v838_v39 = vpop.f32.mrb[3].mxu0  ;;  %v846_v40 = vpop.f32.mrb[3].mxu1 }
 0x16d   : > { %v647_v41 = vadd.f32 %v646_v38, %v644_v37 }
 0x16f   : > { %v648_v43 = vpack.c.bf16 %v647_v41, %v647_v41 }
 0x170   : > { %v637_v44 = vpop.f32.mrb[4].mxu0 }
 0x171   : > { %v638_v45 = vadd.f32 %v817_v42, %v637_v44  ;;  %650 = vst.msk [vmem:[%s434_s24] sm:$0xf] %vm649_vm2, %v648_v43  ;;  %v853_v46 = vpop.f32.mrb[5].mxu0 }
 0x172   : > { %v640_v47 = vpop.f32.mrb[6].mxu0 }
 0x173   : > { %v651_v48 = vpack.c.bf16 %v638_v45, %v638_v45  ;;  %v854_v49 = vpop.f32.mrb[7].mxu0 }
 0x175   : > { %652 = vst.msk [vmem:[%s441_s28] sm:$0xf] %vm649_vm2, %v651_v48 }
 0x176 PF: > { %s21_s15 = sadd.s32 1, %s903_s15   ;;  %s1067_s13 = smov %s899_s14 }
 0x177   : > { %p18_p5 = scmp.ge.s32.totalorder %s21_s15, 4   ;;  %s1068_s14 = smov %s1070_s16 }
 0x179   :  { %20 = sbr.rel (!%p18_p5) target bundleno = 2 (0x2), region = 104 }

// kernel: multi_head_attention_cross.6
= control target key start
LH: loop header
LB: loop body
LE: loop exit
PB: predicated region body
PF: predicated region fallthrough
CT: control target
= control target key end

     0   :  { %s1256_s15 = smov 0   ;;  %s1258_s16 = smov 0   ;;  %s1407_s0 = inlined_call_operand.vmem [shape: bf16[2,16,32], index: 0, kind: input, shape index: {}]   ;;  %s1408_s1 = inlined_call_operand.vmem [shape: bf16[2,8,32], index: 1, kind: input, shape index: {}]   ;;  %s1409_s2 = inlined_call_operand.vmem [shape: bf16[2,8,32], index: 2, kind: input, shape index: {}]   ;;  %s1410_s3 = inlined_call_operand.vmem [shape: bf16[2,16,32], index: 3, kind: output, shape index: {0}]   ;;  %s1411_s4 = inlined_call_operand.vmem [shape: f32[2,4,16,8], index: 4, kind: output, shape index: {1}]  }
   0x1   :  { %s1260_s17 = smov 0  }
   0x2 LB: > { %s27_s18 = sadd.s32 1, %s1217_s16  ;;  %p1018_p0 = scmp.ge.s32.totalorder %s1221_s17, 1  ;;  %s1221_s17 = sphi %s1260_s17, %s15_s17   ;;  %s1217_s16 = sphi %s1258_s16, %s1413_s16   ;;  %s1213_s15 = sphi %s1256_s15, %s1412_s15  }
   0x3   : > { %p29_p1 = scmp.ge.s32.totalorder %s27_s18, 2  ;;  %p206_p2 = scmp.lt.s32.totalorder %s1221_s17, 3 }
   0x5   : > { %s1415_s18 = smov (%p29_p1, %s27_s18), 0  ;;  %p207_p3 = pnand %p1018_p0, %p206_p2 }
   0x6   : > { %p258_p4 = scmp.lt.s32.totalorder (!%p207_p3), %s1213_s15, 1  ;;  %v1223_v0 = vmov (!%p207_p3), 0.0   ;;  %vm1224_vm0 = vmmov (!%p207_p3), 0   ;;  %vm305_vm1 = vcmask (!%p207_p3), 64512   ;;  %s1225_s27 = smov (!%p207_p3), 120   ;;  %vm381_vm2 = vcmask (!%p207_p3), 1043456  }
   0x7   : > { %210 = sbr.rel (%p207_p3) target bundleno = 1496 (0x5d8), region = 32  ;;  %1069 = vmatprep.subr.bf16.mxu0 (!%p207_p3), %v1223_v0  ;;  %1071 = vmatprep.mubr.msk.bf16.mxu0 (!%p207_p3), %vm1224_vm0, %v1223_v0  ;;  %s1226_s28 = smov (!%p207_p3), 104   ;;  %vm836_vm3 = vcmask (!%p207_p3), 130048   ;;  %vm839_vm4 = vcmask (!%p207_p3), 195584   ;;  %vm850_vm5 = vcmask (!%p207_p3), 257024  }
   0x8   : > { %1075 = vmatprep.subr.bf16.mxu1 (!%p207_p3), %v1223_v0  ;;  %1077 = vmatprep.mubr.msk.bf16.mxu1 (!%p207_p3), %vm1224_vm0, %v1223_v0  ;;  %s1227_s6 = smov (!%p207_p3), 112   ;;  %s1228_s11 = smov (!%p207_p3), 8  }
   0x9   : > { %s1229_s12 = smov (!%p207_p3), 16   ;;  %s1230_s13 = smov (!%p207_p3), 24  }
   0xe   : > { %s1417_s15 = smov (!%p258_p4, %s1213_s15), 1 }
   0xf   : > { %s1021_s19 = sshll.u32 %s1417_s15, 2  ;;  %s1048_s23 = sshll.u32 %s1417_s15, 3 }
  0x10   : > { %s270_s22 = scalar_lea.vmem %s1408_s1, %s1021_s19  ;;  %s265_s26 = scalar_lea.vmem %s1407_s0, %s1048_s23 }
  0x11   : > { %v298_v1 = vld [vmem:[%s270_s22] sm:$0xf]  ;;  %s274_s5 = scalar_lea.vmem %s1409_s2, %s1021_s19  ;;  %s1050_s7 = sshll.u32 %s1417_s15, 6 }
  0x12   : > { %v310_v2 = vsel %vm305_vm1, %v298_v1, 0  ;;  %v1165_v3 = vld [vmem:[%s265_s26] sm:$0xff]   ;;  %v1030_v10 = vcombine.low %v298_v1, %v298_v1  ;;  %s1323_s10 = scalar_lea.vmem %s1411_s4, %s1050_s7  ;;  %s283_s20 = scalar_lea.vmem %s1410_s3, %s1048_s23 }
  0x13   : > { %1070 = vmatpush3.bf16.xpose.msra.mxu0 %v310_v2  ;;  %v1310_v21 = vld [vmem:[%s274_s5] sm:$0xf] }
  0x14   : > { %1087 = vmatprep.subr.bf16.mxu0 %v1223_v0  ;;  %v383_v22 = vsel %vm381_vm2, %v1310_v21, 0 }
  0x15   : > { %1076 = vmatpush3.bf16.msra.mxu1 %v383_v22 }
  0x16   : > { %1081 = vmatprep.subr.bf16.mxu1 %v1223_v0 }
  0x1a   : > { %1072 = vmatmul.mubr.msk.bf16.vlgmr.msra.gmra.mrb[0].mxu0 %vm305_vm1, %v1165_v3 }
  0x1b   : > { %1089 = vmatprep.mubr.msk.bf16.mxu0 %vm1224_vm0, %v1223_v0 }
  0xed   : > { %v346_v4 = vpop.f32.mrb[0].mxu0 }
  0xee   : > { %v1073_v5 = vpop.f32.mrb[1].mxu0  ;;  %v353_v6 = vsel %vm305_vm1, %v346_v4, -inf }
  0xef   : > { %354 = vmax.xlane.f32.xlu0 %v353_v6  ;;  %v349_v7 = vpop.f32.mrb[2].mxu0 }
  0xf0   : > { %v1074_v8 = vpop.f32.mrb[3].mxu0  ;;  %v356_v9 = vsel %vm305_vm1, %v349_v7, -inf }
  0xf3   : > { %357 = vmax.xlane.f32.xlu0 %v356_v9 }
 0x109   : > { %431 = vrot.lane.b32.xlu0 %v1030_v10, %s1225_s27 }
 0x10d   : > { %686 = vrot.lane.b32.xlu0 %v1030_v10, %s1226_s28 }
 0x17c   : > { %v355_v11 = vpop.xlane.xlu0 %354 }
 0x17d   : > { %v359_v12 = vsub.f32 %v346_v4, %v355_v11 }
 0x17f   : > { %v361_v13 = vmul.f32 1.442695, %v359_v12 }
 0x180   : > { %v358_v14 = vpop.xlane.xlu0 %357 }
 0x181   : > { %1167 = vpow2.f32 %v361_v13  ;;  %v360_v15 = vsub.f32 %v349_v7, %v358_v14 }
 0x183   : > { %v363_v16 = vmul.f32 1.442695, %v360_v15 }
 0x184   : > { %v432_v28 = vpop.permute.xlu0 %431 }
 0x185   : > { %1169 = vpow2.f32 %v363_v16  ;;  %v437_v31 = vsel %vm305_vm1, %v432_v28, 0 }
 0x188   : > { %v687_v35 = vpop.permute.xlu0 %686 }
 0x189   : > { %v692_v37 = vsel %vm305_vm1, %v687_v35, 0 }
 0x18b   : > { %v1168_v17 = vpop.eup %1167 }
 0x18c   : > { %v365_v18 = vsel %vm305_vm1, %v1168_v17, 0.0 }
 0x18d   : > { %366 = vadd.xlane.f32.xlu1 %v365_v18 }
 0x18f   : > { %v1170_v19 = vpop.eup %1169 }
 0x190   : > { %v368_v20 = vsel %vm305_vm1, %v1170_v19, 0.0 }
 0x191   : > { %369 = vadd.xlane.f32.xlu1 %v368_v20 }
 0x1a2   : > { %426 = vrot.lane.b32.xlu1 %v1165_v3, %s1225_s27 }
 0x1a6   : > { %560 = vrot.lane.b32.xlu1 %v1030_v10, %s1227_s6 }
 0x1aa   : > { %558 = vrot.lane.b32.xlu1 %v1165_v3, %s1227_s6 }
 0x1ae   : > { %684 = vrot.lane.b32.xlu1 %v1165_v3, %s1226_s28 }
 0x21a   : > { %v367_v23 = vpop.xlane.xlu1 %366 }
 0x21b   : > { %1171 = vrcp.f32 %v367_v23 }
 0x21e   : > { %v370_v24 = vpop.xlane.xlu1 %369 }
 0x21f   : > { %1173 = vrcp.f32 %v370_v24  ;;  %v1034_v24 = vcombine.low %v1310_v21, %v1310_v21 }
 0x222   : > { %v427_v30 = vpop.permute.xlu1 %426 }
 0x225   : > { %v1172_v25 = vpop.eup %1171 }
 0x226   : > { %v373_v26 = vmul.f32 %v1172_v25, %v1168_v17  ;;  %v561_v33 = vpop.permute.xlu1 %560 }
 0x227   : > { %v566_v34 = vsel %vm305_vm1, %v561_v33, 0 }
 0x228   : > { %375 = vst.msk [vmem:[%s1323_s10] sm:$0xff] %vm305_vm1, %v373_v26 }
 0x229   : > { %v1174_v27 = vpop.eup %1173 }
 0x22a   : > { %v374_v29 = vmul.f32 %v1174_v27, %v1170_v19  ;;  %v559_v36 = vpop.permute.xlu1 %558 }
 0x22c   : > { %376 = vst.msk [vmem:[%s1323_s10 + $0x8] sm:$0xff] %vm305_vm1, %v374_v29  ;;  %v377_v32 = vpack.c.bf16 %v374_v29, %v373_v26 }
 0x22e   : > { %1078 = vmatmul.mubr.msk.bf16.vlgmr.msra.gmra.mrb[0].mxu1 %vm305_vm1, %v377_v32  ;;  %v685_v38 = vpop.permute.xlu1 %684 }
 0x22f   : > { %1082 = vmatpush3.bf16.xpose.msra.mxu1 %v437_v31  ;;  %1083 = vmatprep.mubr.msk.bf16.mxu1 %vm1224_vm0, %v1223_v0 }
 0x230   : > { %1093 = vmatprep.subr.bf16.mxu1 %v1223_v0 }
 0x236   : > { %1084 = vmatmul.mubr.msk.bf16.vlgmr.msra.gmra.mrb[4].mxu1 %vm305_vm1, %v427_v30 }
 0x237   : > { %1094 = vmatpush3.bf16.xpose.msra.mxu1 %v566_v34  ;;  %1095 = vmatprep.mubr.msk.bf16.mxu1 %vm1224_vm0, %v1223_v0 }
 0x238   : > { %1105 = vmatprep.subr.bf16.mxu1 %v1223_v0 }
 0x23e   : > { %1096 = vmatmul.mubr.msk.bf16.vlgmr.msra.gmra.mrb[8].mxu1 %vm305_vm1, %v559_v36 }
 0x23f   : > { %1106 = vmatpush3.bf16.xpose.msra.mxu1 %v692_v37  ;;  %1107 = vmatprep.mubr.msk.bf16.mxu1 %vm1224_vm0, %v1223_v0 }
 0x246   : > { %1108 = vmatmul.mubr.msk.bf16.vlgmr.msra.gmra.mrb[12].mxu1 %vm305_vm1, %v685_v38 }
 0x301   : > { %v1344_v39 = vpop.f32.mrb[0].mxu1 }
 0x302   : > { %v1079_v40 = vpop.f32.mrb[1].mxu1 }
 0x303   : > { %v1346_v41 = vpop.f32.mrb[2].mxu1 }
 0x304   : > { %v1080_v42 = vpop.f32.mrb[3].mxu1 }
 0x309   : > { %v473_v43 = vpop.f32.mrb[4].mxu1 }
 0x30a   : > { %v1085_v44 = vpop.f32.mrb[5].mxu1  ;;  %v480_v45 = vsel %vm305_vm1, %v473_v43, -inf }
 0x30b   : > { %481 = vmax.xlane.f32.xlu0 %v480_v45  ;;  %v476_v46 = vpop.f32.mrb[6].mxu1 }
 0x30c   : > { %v1086_v47 = vpop.f32.mrb[7].mxu1  ;;  %v483_v48 = vsel %vm305_vm1, %v476_v46, -inf }
 0x30d   : > { %484 = vmax.xlane.f32.xlu1 %v483_v48 }
 0x311   : > { %v602_v49 = vpop.f32.mrb[8].mxu1 }
 0x312   : > { %v1097_v50 = vpop.f32.mrb[9].mxu1  ;;  %v609_v51 = vsel %vm305_vm1, %v602_v49, -inf }
 0x313   : > { %610 = vmax.xlane.f32.xlu0 %v609_v51  ;;  %v605_v52 = vpop.f32.mrb[10].mxu1 }
 0x314   : > { %v1098_v53 = vpop.f32.mrb[11].mxu1  ;;  %v612_v54 = vsel %vm305_vm1, %v605_v52, -inf }
 0x317   : > { %613 = vmax.xlane.f32.xlu0 %v612_v54 }
 0x319   : > { %v728_v55 = vpop.f32.mrb[12].mxu1 }
 0x31a   : > { %v1109_v56 = vpop.f32.mrb[13].mxu1  ;;  %v735_v57 = vsel %vm305_vm1, %v728_v55, -inf }
 0x31b   : > { %736 = vmax.xlane.f32.xlu0 %v735_v57  ;;  %v731_v58 = vpop.f32.mrb[14].mxu1 }
 0x31c   : > { %v738_v59 = vsel %vm305_vm1, %v731_v58, -inf  ;;  %v1110_v60 = vpop.f32.mrb[15].mxu1 }
 0x31d   : > { %739 = vmax.xlane.f32.xlu1 %v738_v59 }
 0x398   : > { %v482_v61 = vpop.xlane.xlu0 %481 }
 0x399   : > { %v486_v62 = vsub.f32 %v473_v43, %v482_v61 }
 0x39a   : > { %v485_v63 = vpop.xlane.xlu1 %484 }
 0x39b   : > { %v488_v1 = vmul.f32 1.442695, %v486_v62  ;;  %v487_v2 = vsub.f32 %v476_v46, %v485_v63 }
 0x39d   : > { %1175 = vpow2.f32 %v488_v1  ;;  %v490_v3 = vmul.f32 1.442695, %v487_v2 }
 0x39f   : > { %1177 = vpow2.f32 %v490_v3 }
 0x3a0   : > { %v611_v4 = vpop.xlane.xlu0 %610 }
 0x3a1   : > { %v615_v5 = vsub.f32 %v602_v49, %v611_v4 }
 0x3a3   : > { %v617_v6 = vmul.f32 1.442695, %v615_v5 }
 0x3a4   : > { %v614_v7 = vpop.xlane.xlu0 %613 }
 0x3a5   : > { %1179 = vpow2.f32 %v617_v6  ;;  %v616_v8 = vsub.f32 %v605_v52, %v614_v7 }
 0x3a7   : > { %v1176_v9 = vpop.eup %1175  ;;  %v619_v10 = vmul.f32 1.442695, %v616_v8 }
 0x3a8   : > { %v737_v11 = vpop.xlane.xlu0 %736  ;;  %v492_v12 = vsel %vm305_vm1, %v1176_v9, 0.0 }
 0x3a9   : > { %v1178_v13 = vpop.eup %1177  ;;  %1181 = vpow2.f32 %v619_v10  ;;  %v741_v14 = vsub.f32 %v728_v55, %v737_v11  ;;  %493 = vadd.xlane.f32.xlu0 %v492_v12 }
 0x3aa   : > { %v495_v15 = vsel %vm305_vm1, %v1178_v13, 0.0  ;;  %v740_v25 = vpop.xlane.xlu1 %739 }
 0x3ab   : > { %v743_v16 = vmul.f32 1.442695, %v741_v14  ;;  %496 = vadd.xlane.f32.xlu1 %v495_v15  ;;  %v742_v26 = vsub.f32 %v731_v58, %v740_v25 }
 0x3ad   : > { %1183 = vpow2.f32 %v743_v16  ;;  %v745_v27 = vmul.f32 1.442695, %v742_v26 }
 0x3af   : > { %v1180_v17 = vpop.eup %1179  ;;  %1185 = vpow2.f32 %v745_v27 }
 0x3b0   : > { %v621_v18 = vsel %vm305_vm1, %v1180_v17, 0.0 }
 0x3b1   : > { %622 = vadd.xlane.f32.xlu0 %v621_v18 }
 0x3b3   : > { %v1182_v19 = vpop.eup %1181 }
 0x3b4   : > { %v624_v20 = vsel %vm305_vm1, %v1182_v19, 0.0 }
 0x3b5   : > { %625 = vadd.xlane.f32.xlu1 %v624_v20 }
 0x3b7   : > { %v1184_v22 = vpop.eup %1183 }
 0x3b8   : > { %v747_v23 = vsel %vm305_vm1, %v1184_v22, 0.0 }
 0x3b9   : > { %748 = vadd.xlane.f32.xlu0 %v747_v23  ;;  %v1186_v28 = vpop.eup %1185 }
 0x3ba   : > { %v750_v29 = vsel %vm305_vm1, %v1186_v28, 0.0 }
 0x3c6   : > { %635 = vrot.lane.b32.xlu1 %v1034_v24, %s1227_s6 }
 0x3cf   : > { %509 = vrot.lane.b32.xlu0 %v1034_v24, %s1225_s27 }
 0x3ea   : > { %751 = vadd.xlane.f32.xlu1 %v750_v29 }
 0x3fb   : > { %761 = vrot.lane.b32.xlu1 %v1034_v24, %s1226_s28 }
 0x436   : > { %v494_v30 = vpop.xlane.xlu0 %493 }
 0x437   : > { %1187 = vrcp.f32 %v494_v30 }
 0x438   : > { %v497_v31 = vpop.xlane.xlu1 %496 }
 0x439   : > { %1189 = vrcp.f32 %v497_v31 }
 0x43e   : > { %v623_v21 = vpop.xlane.xlu0 %622 }
 0x43f   : > { %1191 = vrcp.f32 %v623_v21 }
 0x441   : > { %v1188_v32 = vpop.eup %1187 }
 0x442   : > { %v500_v33 = vmul.f32 %v1188_v32, %v1176_v9  ;;  %v626_v34 = vpop.xlane.xlu1 %625 }
 0x443   : > { %v1190_v35 = vpop.eup %1189  ;;  %1193 = vrcp.f32 %v626_v34 }
 0x444   : > { %1032 = vst.msk [vmem:[%s1323_s10 + $0x10] sm:$0xff] %vm305_vm1, %v500_v33  ;;  %v501_v36 = vmul.f32 %v1190_v35, %v1178_v13 }
 0x446   : > { %1033 = vst.msk [vmem:[%s1323_s10 + $0x18] sm:$0xff] %vm305_vm1, %v501_v36  ;;  %v749_v37 = vpop.xlane.xlu0 %748  ;;  %v636_v44 = vpop.permute.xlu1 %635  ;;  %v505_v46 = vpack.c.bf16 %v501_v36, %v500_v33 }
 0x447   : > { %1195 = vrcp.f32 %v749_v37  ;;  %v641_v48 = vsel %vm381_vm2, %v636_v44, 0 }
 0x449   : > { %v1192_v38 = vpop.eup %1191 }
 0x44a   : > { %v629_v40 = vmul.f32 %v1192_v38, %v1180_v17  ;;  %v510_v42 = vpop.permute.xlu0 %509 }
 0x44b   : > { %v515_v43 = vsel %vm381_vm2, %v510_v42, 0 }
 0x44c   : > { %1037 = vst.msk [vmem:[%s1323_s10 + $0x20] sm:$0xff] %vm305_vm1, %v629_v40  ;;  %1088 = vmatpush3.bf16.msra.mxu0 %v515_v43 }
 0x44d   : > { %v1194_v45 = vpop.eup %1193  ;;  %1099 = vmatprep.subr.bf16.mxu0 %v1223_v0 }
 0x44e   : > { %v630_v47 = vmul.f32 %v1194_v45, %v1182_v19 }
 0x44f   : > { %1090 = vmatmul.mubr.msk.bf16.vlgmr.msra.gmra.mrb[4].mxu0 %vm305_vm1, %v505_v46 }
 0x450   : > { %1038 = vst.msk [vmem:[%s1323_s10 + $0x28] sm:$0xff] %vm305_vm1, %v630_v47  ;;  %1100 = vmatpush3.bf16.msra.mxu0 %v641_v48  ;;  %1101 = vmatprep.mubr.msk.bf16.mxu0 %vm1224_vm0, %v1223_v0  ;;  %v634_v51 = vpack.c.bf16 %v630_v47, %v629_v40 }
 0x451   : > { %v1196_v49 = vpop.eup %1195  ;;  %1111 = vmatprep.subr.bf16.mxu0 %v1223_v0 }
 0x452   : > { %v755_v50 = vmul.f32 %v1196_v49, %v1184_v22 }
 0x454   : > { %1041 = vst.msk [vmem:[%s1323_s10 + $0x30] sm:$0xff] %vm305_vm1, %v755_v50 }
 0x457   : > { %1102 = vmatmul.mubr.msk.bf16.vlgmr.msra.gmra.mrb[8].mxu0 %vm305_vm1, %v634_v51 }
 0x458   : > { %1113 = vmatprep.mubr.msk.bf16.mxu0 %vm1224_vm0, %v1223_v0 }
 0x477   : > { %v752_v52 = vpop.xlane.xlu1 %751 }
 0x478   : > { %1197 = vrcp.f32 %v752_v52 }
 0x47b   : > { %v762_v53 = vpop.permute.xlu1 %761 }
 0x47c   : > { %v767_v54 = vsel %vm381_vm2, %v762_v53, 0 }
 0x47d   : > { %1112 = vmatpush3.bf16.msra.mxu0 %v767_v54 }
 0x482   : > { %v1198_v55 = vpop.eup %1197 }
 0x483   : > { %v756_v56 = vmul.f32 %v1198_v55, %v1186_v28 }
 0x485   : > { %1042 = vst.msk [vmem:[%s1323_s10 + $0x38] sm:$0xff] %vm305_vm1, %v756_v56  ;;  %v760_v57 = vpack.c.bf16 %v756_v56, %v755_v50 }
 0x487   : > { %1114 = vmatmul.mubr.msk.bf16.vlgmr.msra.gmra.mrb[12].mxu0 %vm305_vm1, %v760_v57 }
 0x522   : > { %v551_v58 = vpop.f32.mrb[4].mxu0 }
 0x523   : > { %v1091_v59 = vpop.f32.mrb[5].mxu0 }
 0x524   : > { %v554_v60 = vpop.f32.mrb[6].mxu0 }
 0x525   : > { %v1149_v61 = vpack.i.bf16 %v554_v60, %v551_v58  ;;  %v1092_v62 = vpop.f32.mrb[7].mxu0 }
 0x527   : > { %1150 = vrot.lane.b32.xlu1 %v1149_v61, %s1228_s11 }
 0x52a   : > { %v677_v0 = vpop.f32.mrb[8].mxu0 }
 0x52b   : > { %v1103_v63 = vpop.f32.mrb[9].mxu0 }
 0x52c   : > { %v680_v1 = vpop.f32.mrb[10].mxu0 }
 0x52d   : > { %v1154_v2 = vpack.i.bf16 %v680_v1, %v677_v0  ;;  %v1104_v3 = vpop.f32.mrb[11].mxu0 }
 0x52f   : > { %1155 = vrot.lane.b32.xlu0 %v1154_v2, %s1229_s12 }
 0x55a   : > { %v803_v4 = vpop.f32.mrb[12].mxu0 }
 0x55b   : > { %v1115_v5 = vpop.f32.mrb[13].mxu0 }
 0x55c   : > { %v806_v6 = vpop.f32.mrb[14].mxu0 }
 0x55d   : > { %v1159_v7 = vpack.i.bf16 %v806_v6, %v803_v4  ;;  %v1116_v8 = vpop.f32.mrb[15].mxu0 }
 0x55f   : > { %1160 = vrot.lane.b32.xlu1 %v1159_v7, %s1230_s13 }
 0x599   : > { %v1151_v9 = vpop.permute.xlu1 %1150 }
 0x59a   : > { %v1153_v11 = vunpack.i.h.bf16 %v1151_v9  ;;  %v1152_v12 = vunpack.i.l.bf16 %v1151_v9 }
 0x59c   : > { %v835_v16 = vsel %vm305_vm1, %v1346_v41, %v1153_v11  ;;  %v834_v17 = vsel %vm305_vm1, %v1344_v39, %v1152_v12 }
 0x5a1   : > { %v1156_v10 = vpop.permute.xlu0 %1155 }
 0x5a2   : > { %v1158_v13 = vunpack.i.h.bf16 %v1156_v10  ;;  %v1157_v14 = vunpack.i.l.bf16 %v1156_v10 }
 0x5a4   : > { %v838_v20 = vsel %vm836_vm3, %v835_v16, %v1158_v13  ;;  %v837_v22 = vsel %vm836_vm3, %v834_v17, %v1157_v14 }
 0x5d1   : > { %v1161_v15 = vpop.permute.xlu1 %1160 }
 0x5d2   : > { %v1163_v18 = vunpack.i.h.bf16 %v1161_v15  ;;  %v1162_v19 = vunpack.i.l.bf16 %v1161_v15 }
 0x5d4   : > { %v841_v23 = vsel %vm839_vm4, %v838_v20, %v1163_v18  ;;  %v840_v24 = vsel %vm839_vm4, %v837_v22, %v1162_v19 }
 0x5d5   : > { %v1052_v25 = vpack.c.bf16 %v841_v23, %v841_v23  ;;  %v1051_v26 = vpack.c.bf16 %v840_v24, %v840_v24 }
 0x5d7   : > { %852 = vst.msk [vmem:[%s283_s20 + $0x4] sm:$0xf] %vm850_vm5, %v1052_v25  ;;  %851 = vst.msk [vmem:[%s283_s20] sm:$0xf] %vm850_vm5, %v1051_v26 }
 0x5d8 PF: > { %s15_s17 = sadd.s32 1, %s1221_s17   ;;  %s1412_s15 = smov %s1217_s16 }
 0x5d9   : > { %p12_p5 = scmp.ge.s32.totalorder %s15_s17, 4   ;;  %s1413_s16 = smov %s1415_s18 }
 0x5db   :  { %14 = sbr.rel (!%p12_p5) target bundleno = 2 (0x2), region = 83 }

</bundles_post_ra>
